<compile_context>
chip_gen: v6e
topology: v6e:2x2x1
jax: 0.10.0
libtpu: 0.0.40
codegen_flags: <defaults>
</compile_context>

<pallas_src>
import math
from collections import namedtuple

import jax
import jax.numpy as jnp
from jax.experimental import pallas as pl
from jax.experimental.pallas import tpu as pltpu

Genotype = namedtuple("Genotype", "normal normal_concat reduce reduce_concat")

# SNAS-style dense normal cell: node 2 gets 2 edges, node 3 gets 3 edges.
GENOTYPE = Genotype(
    normal=[
        ("sep_conv_3x3", 1), ("skip_connect", 0),                        # node 2
        ("avg_pool_3x3", 0), ("max_pool_3x3", 1), ("sep_conv_3x3", 2),   # node 3
    ],
    normal_concat=[2, 3],
    reduce=[], reduce_concat=[],
)

BN_EPS = 1e-5
NEG_FILL = -1e30    # stands in for -inf padding in max-pool (center is always a candidate)


def _const_index_map(ndim):
    return lambda b: (0,) * ndim


# ---------------------------------------------------------------------------
# pltpu.roll capability / sign-convention probe (run once, lazily)
# ---------------------------------------------------------------------------
_ROLL_MODE = None


def _probe_roll():
    """Returns ("roll", row_sign, lane_sign) if pltpu.roll lowers on both the
    sublane and lane axes; signs are chosen so roll(x, sign*d, axis) realises
    out[i] = in[i-d].  Falls back to ("slice", 1, 1) (concat/slice shifts)."""
    global _ROLL_MODE
    if _ROLL_MODE is not None:
        return _ROLL_MODE
    try:
        def probe_kernel(o_ref):
            row = jax.lax.broadcasted_iota(jnp.float32, (8, 128), 0)
            lane = jax.lax.broadcasted_iota(jnp.float32, (8, 128), 1)
            o_ref[0] = pltpu.roll(row, 1, axis=0)
            o_ref[1] = pltpu.roll(lane, 1, axis=1)

        probe = pl.pallas_call(
            probe_kernel,
            out_shape=jax.ShapeDtypeStruct((2, 8, 128), jnp.float32),
        )()
        probe = jax.block_until_ready(probe)
        r00 = float(probe[0, 0, 0])   # 7 -> jnp.roll convention, 1 -> opposite
        l00 = float(probe[1, 0, 0])   # 127 -> jnp.roll convention, 1 -> opposite
        _ROLL_MODE = ("roll", 1 if r00 > 3.5 else -1, 1 if l00 > 63.5 else -1)
    except Exception:
        _ROLL_MODE = ("slice", 1, 1)
    return _ROLL_MODE


# ---------------------------------------------------------------------------
# Fused cell kernel (body generated from the genotype)
# ---------------------------------------------------------------------------

def _build_cell_kernel(op_names, indices, concat, steps, H, W, C, nb, Lin,
                       op_nrefs, roll_mode):
    WC = W * C
    M = nb * H
    n_cat = len(concat)
    kind, row_sign, lane_sign = roll_mode

    def kernel(*refs):
        s01_ref, prew_ref, press_ref, mask_ref = refs[:4]
        out_ref = refs[-1]
        op_refs = []
        pos = 4
        for cnt in op_nrefs:
            op_refs.append(refs[pos:pos + cnt])
            pos += cnt

        # precomputed boundary / pooling constants (hoisted once, reused by all ops)
        keep_top = mask_ref[0]     # 0 on the first row of every image, else 1
        keep_bot = mask_ref[1]     # 0 on the last row of every image, else 1
        keep_left = mask_ref[2]    # 0 on lanes with w == 0, else 1
        keep_right = mask_ref[3]   # 0 on lanes with w == W-1, else 1
        avg_recip = mask_ref[4]    # 1 / (valid 3x3 window size); count_include_pad=False
        neg_top = mask_ref[5]      # NEG_FILL on the first row of every image, else 0
        neg_bot = mask_ref[6]
        neg_left = mask_ref[7]
        neg_right = mask_ref[8]

        def shift_rows(x, d):
            # out[i, :] = x[i - d, :]; boundary rows are always masked by the caller.
            if kind == "roll":
                return pltpu.roll(x, (row_sign * d) % M, axis=0)
            z = jnp.zeros((abs(d), x.shape[1]), x.dtype)
            if d > 0:
                return jnp.concatenate([z, x[:M - d, :]], axis=0)
            return jnp.concatenate([x[-d:, :], z], axis=0)

        def shift_lanes(x, d):
            # out[:, j] = x[:, j - d]; boundary lanes are always masked by the caller.
            L = x.shape[1]
            if kind == "roll":
                return pltpu.roll(x, (lane_sign * d) % L, axis=1)
            z = jnp.zeros((x.shape[0], abs(d)), x.dtype)
            if d > 0:
                return jnp.concatenate([z, x[:, :L - d]], axis=1)
            return jnp.concatenate([x[:, -d:], z], axis=1)

        def preprocess(x01):
            """ReLU -> (1x1 conv of s0 | 1x1 conv of s1) as ONE block-diagonal
            (M, Lin) @ (Lin, 2*WC) bf16 MXU matmul -> folded BN -> split."""
            xb = jnp.maximum(x01, 0.0).astype(jnp.bfloat16)
            y = jnp.dot(xb, prew_ref[...], preferred_element_type=jnp.float32)
            ss = press_ref[...]                       # (2, 2*WC): [scale, shift]
            y = y * ss[0:1, :] + ss[1:2, :]
            return y[:, :WC], y[:, WC:2 * WC]

        def sep_conv_3x3(x, params):
            """Two stacked (ReLU -> depthwise 3x3 -> pointwise 1x1 -> BN) halves.
            The 3 kernel-row banded matmuls are fused into one
            (M, 3*WC) @ (3*WC, WC) matmul (K=384 fills the MXU)."""
            s_ref, p_ref, ss_ref = params
            h = x
            for half in range(2):
                r = jnp.maximum(h, 0.0)
                r_dn = shift_rows(r, 1) * keep_top    # rows h-1 (kernel row 0), zero-padded
                r_up = shift_rows(r, -1) * keep_bot   # rows h+1 (kernel row 2), zero-padded
                xcat = jnp.concatenate([r_dn, r, r_up], axis=-1).astype(jnp.bfloat16)
                acc = jnp.dot(xcat, s_ref[half], preferred_element_type=jnp.float32)
                y = jnp.dot(acc.astype(jnp.bfloat16), p_ref[half],
                            preferred_element_type=jnp.float32)
                ss = ss_ref[half]                     # (2, WC)
                h = y * ss[0:1, :] + ss[1:2, :]
            return h

        def avg_pool_3x3(x):
            """3x3 / stride 1 / pad 1 avg pool, count_include_pad=False (VPU/XLU only)."""
            vs = x + shift_rows(x, 1) * keep_top + shift_rows(x, -1) * keep_bot
            hs = vs + shift_lanes(vs, C) * keep_left + shift_lanes(vs, -C) * keep_right
            return hs * avg_recip

        def max_pool_3x3(x):
            """3x3 / stride 1 / pad 1 max pool (padding behaves as -inf), VPU/XLU only."""
            wm = jnp.maximum(x, jnp.maximum(shift_lanes(x, C) + neg_left,
                                            shift_lanes(x, -C) + neg_right))
            return jnp.maximum(wm, jnp.maximum(shift_rows(wm, 1) + neg_top,
                                               shift_rows(wm, -1) + neg_bot))

        # ---- preprocess both cell inputs with one fused matmul ----
        x01 = s01_ref[...].reshape(M, Lin)
        s0, s1 = preprocess(x01)
        states = [s0, s1]

        # ---- edges / nodes (edge sums fused in-kernel) ----
        e = 0
        for i in range(steps):
            acc = None
            for j in range(e, e + i + 2):
                h = states[indices[j]]
                name = op_names[j]
                if name == "sep_conv_3x3":
                    h = sep_conv_3x3(h, op_refs[j])
                elif name == "avg_pool_3x3":
                    h = avg_pool_3x3(h)
                elif name == "max_pool_3x3":
                    h = max_pool_3x3(h)
                elif name == "skip_connect":
                    pass                              # Identity (stride-1 normal cell)
                else:
                    # TODO(synk): other genotype ops (dil_conv, 5x5, stride-2 variants) not implemented.
                    raise NotImplementedError(name)
                acc = h if acc is None else acc + h
            e += i + 2
            states.append(acc)

        # ---- lane-dense output: concat states along lanes -> one 256-wide store ----
        cat = jnp.concatenate([states[idx] for idx in concat], axis=-1)
        out_ref[...] = cat.reshape(nb, H, n_cat * WC)

    return kernel


# ---------------------------------------------------------------------------
# Pure-JAX reference (same math; mirrors the kernel's bf16 rounding points)
# ---------------------------------------------------------------------------

def _bf16(x):
    return x.astype(jnp.bfloat16)


def _ref_relu_conv_bn(x, p):
    N, H, W, Cin = x.shape
    y = jnp.dot(_bf16(jnp.maximum(x, 0.0)).reshape(-1, Cin), _bf16(p["w"]),
                preferred_element_type=jnp.float32)
    y = y * p["scale"] + p["shift"]
    return y.reshape(N, H, W, -1)


def _ref_sep_conv(x, p):
    h = x
    for half in range(2):
        N, H, W, C = h.shape
        hb = _bf16(jnp.maximum(h, 0.0)).astype(jnp.float32)
        kb = _bf16(p["dw"][half]).astype(jnp.float32)
        xp = jnp.pad(hb, ((0, 0), (1, 1), (1, 1), (0, 0)))
        acc = jnp.zeros_like(hb)
        for dh in range(3):
            for dwi in range(3):
                acc = acc + xp[:, dh:dh + H, dwi:dwi + W, :] * kb[dh, dwi]
        y = jnp.dot(_bf16(acc).reshape(-1, C), _bf16(p["pw"][half]),
                    preferred_element_type=jnp.float32)
        h = (y * p["scale"][half] + p["shift"][half]).reshape(N, H, W, C)
    return h


def _ref_avg_pool(x):
    N, H, W, C = x.shape
    xp = jnp.pad(x, ((0, 0), (1, 1), (1, 1), (0, 0)))
    vs = xp[:, 0:H] + xp[:, 1:H + 1] + xp[:, 2:H + 2]
    s = vs[:, :, 0:W] + vs[:, :, 1:W + 1] + vs[:, :, 2:W + 2]
    hh = jnp.arange(H, dtype=jnp.float32)
    ww = jnp.arange(W, dtype=jnp.float32)
    ch = 1.0 + (hh > 0).astype(jnp.float32) + (hh < H - 1).astype(jnp.float32)
    cw = 1.0 + (ww > 0).astype(jnp.float32) + (ww < W - 1).astype(jnp.float32)
    cnt = (ch[:, None] * cw[None, :])[None, :, :, None]
    return s / cnt


def _ref_max_pool(x):
    N, H, W, C = x.shape
    xp = jnp.pad(x, ((0, 0), (1, 1), (1, 1), (0, 0)), constant_values=-jnp.inf)
    m = xp[:, 1:H + 1, 1:W + 1]
    for dh in range(3):
        for dwi in range(3):
            m = jnp.maximum(m, xp[:, dh:dh + H, dwi:dwi + W])
    return m


# ---------------------------------------------------------------------------
# Cell (mirrors SNAS/model.py::Cell.forward in eval mode)
# ---------------------------------------------------------------------------

class PallasCell:
    def __init__(self, genotype, C_prev_prev, C_prev, C, reduction, reduction_prev, key):
        # TODO(synk): reduction cell (stride-2 ops) and FactorizedReduce preprocess are not
        #             implemented; this covers the normal cell (reduction=False, reduction_prev=False).
        assert not reduction and not reduction_prev
        op_names, indices = zip(*genotype.normal)
        concat = list(genotype.normal_concat)
        assert len(op_names) == len(indices)
        self._steps = int((-3 + math.sqrt(9 + 8 * len(indices))) // 2)
        self._concat = concat
        self.multiplier = len(concat)
        self._op_names = list(op_names)
        self._indices = list(indices)
        self.C = C
        self.C_pp = C_prev_prev
        self.C_p = C_prev

        keys = jax.random.split(key, 2 + len(op_names))
        self.pre0 = self._init_relu_conv_bn(keys[0], C_prev_prev, C)
        self.pre1 = self._init_relu_conv_bn(keys[1], C_prev, C)
        self.op_params = [self._init_sep_conv(k, C) if n == "sep_conv_3x3" else None
                          for k, n in zip(keys[2:], op_names)]
        self._pack_cache = {}

    # ---- synthetic deterministic params; eval-mode BN folded to scale/shift ----
    @staticmethod
    def _fold_bn(key, C):
        a, b, c, d = jax.random.split(key, 4)
        gamma = 1.0 + 0.1 * jax.random.normal(a, (C,), jnp.float32)
        beta = 0.1 * jax.random.normal(b, (C,), jnp.float32)
        mean = 0.1 * jax.random.normal(c, (C,), jnp.float32)
        var = 0.5 + jax.random.uniform(d, (C,), jnp.float32)
        scale = gamma / jnp.sqrt(var + BN_EPS)
        shift = beta - scale * mean
        return scale, shift

    def _init_relu_conv_bn(self, key, Cin, Cout):
        kw, kb = jax.random.split(key, 2)
        w = jax.random.normal(kw, (Cin, Cout), jnp.float32) / math.sqrt(Cin)
        scale, shift = self._fold_bn(kb, Cout)
        return {"w": w, "scale": scale, "shift": shift}

    def _init_sep_conv(self, key, C):
        kd, kp, k1, k2 = jax.random.split(key, 4)
        dw = jax.random.normal(kd, (2, 3, 3, C), jnp.float32) / 3.0
        pw = jax.random.normal(kp, (2, C, C), jnp.float32) / math.sqrt(C)
        s1, h1 = self._fold_bn(k1, C)
        s2, h2 = self._fold_bn(k2, C)
        return {"dw": dw, "pw": pw,
                "scale": jnp.stack([s1, s2]), "shift": jnp.stack([h1, h2])}

    # ---- pack weights / constants (built once, cached) ----
    def _packed(self, H, W, nb):
        key = (H, W, nb)
        if key in self._pack_cache:
            return self._pack_cache[key]
        C = self.C
        WC = W * C
        M = nb * H
        eyeW = jnp.eye(W, dtype=jnp.float32)

        def blkdiag(w):                 # (Cin, Cout) -> (W*Cin, W*Cout)
            return jnp.kron(eyeW, w)

        def dw_band(krow):              # (3, C): W-direction taps of one depthwise kernel row
            m = jnp.zeros((WC, WC), jnp.float32)
            for ow in (-1, 0, 1):
                m = m + jnp.kron(jnp.eye(W, k=-ow, dtype=jnp.float32),
                                 jnp.diag(krow[ow + 1]))
            return m

        def tile_ss(scale, shift):      # (C,) x2 -> (2, W*C) f32
            return jnp.stack([jnp.tile(scale, W), jnp.tile(shift, W)])

        # fused preprocess weight: block_diag(kron(I,W0), kron(I,W1)) -> (W*Cpp+W*Cp, 2*WC)
        b0 = blkdiag(self.pre0["w"])
        b1 = blkdiag(self.pre1["w"])
        L0, L1 = b0.shape[0], b1.shape[0]
        prew = jnp.zeros((L0 + L1, 2 * WC), jnp.float32)
        prew = prew.at[:L0, :WC].set(b0).at[L0:, WC:].set(b1)
        press = jnp.concatenate(
            [tile_ss(self.pre0["scale"], self.pre0["shift"]),
             tile_ss(self.pre1["scale"], self.pre1["shift"])], axis=-1)       # (2, 2*WC)

        # precomputed boundary / pooling constants, stacked into one (9, M, WC) f32 array
        rr = jnp.arange(M, dtype=jnp.int32) % H
        ll = jnp.arange(WC, dtype=jnp.int32)
        wpos = ll // C
        top = jnp.broadcast_to((rr == 0)[:, None], (M, WC))
        bot = jnp.broadcast_to((rr == H - 1)[:, None], (M, WC))
        left = jnp.broadcast_to((wpos == 0)[None, :], (M, WC))
        right = jnp.broadcast_to((wpos == W - 1)[None, :], (M, WC))
        NEG = jnp.float32(NEG_FILL)
        ch = 1.0 + (rr > 0).astype(jnp.float32) + (rr < H - 1).astype(jnp.float32)
        cw = 1.0 + (wpos > 0).astype(jnp.float32) + (wpos < W - 1).astype(jnp.float32)
        avg_recip = 1.0 / (ch[:, None] * cw[None, :])
        masks = jnp.stack([
            jnp.where(top, 0.0, 1.0), jnp.where(bot, 0.0, 1.0),
            jnp.where(left, 0.0, 1.0), jnp.where(right, 0.0, 1.0),
            avg_recip,
            jnp.where(top, NEG, 0.0), jnp.where(bot, NEG, 0.0),
            jnp.where(left, NEG, 0.0), jnp.where(right, NEG, 0.0),
        ]).astype(jnp.float32)

        consts = [prew.astype(jnp.bfloat16), press.astype(jnp.float32), masks]
        op_nrefs = []
        for name, p in zip(self._op_names, self.op_params):
            if name != "sep_conv_3x3":
                op_nrefs.append(0)
                continue
            # (2, 3*WC, WC): the 3 kernel-row banded matrices stacked along K
            S = jnp.stack([
                jnp.concatenate([dw_band(p["dw"][half, dh]) for dh in range(3)], axis=0)
                for half in range(2)
            ]).astype(jnp.bfloat16)
            P = jnp.stack([blkdiag(p["pw"][0]),
                           blkdiag(p["pw"][1])]).astype(jnp.bfloat16)         # (2, WC, WC)
            SS = jnp.stack([tile_ss(p["scale"][0], p["shift"][0]),
                            tile_ss(p["scale"][1], p["shift"][1])])           # (2, 2, WC)
            consts.extend([S, P, SS])
            op_nrefs.append(3)

        packed = (consts, op_nrefs)
        self._pack_cache[key] = packed
        return packed

    # ---- forward (Pallas) ----
    def __call__(self, s0_nchw, s1_nchw, drop_prob=0.0):
        # TODO(synk): drop_path is training-only stochastic depth; eval-mode forward ignores it.
        N, _, H, W = s0_nchw.shape
        C = self.C
        WC = W * C
        n_cat = len(self._concat)
        assert WC % 128 == 0, "lane-dense layout requires W*C to be a multiple of 128"
        # TODO(synk): the kron-packed dense weights scale as (W*C)^2 and waste ~W x MXU FLOPs;
        #             switch to a per-W-tile formulation before using at large feature maps.
        assert WC <= 1024, "kron-packed weights would blow up VMEM at this W*C"

        # Images per grid step: keep >=2 grid steps when N >= 2 (both v7x TCs busy),
        # fold the rest of the batch into the matmul M dimension; cap by a VMEM budget
        # of ~16 live (nb*H, W*C) f32 slabs (well under the 32 MiB scoped default).
        target_blocks = 2 if N >= 2 else 1
        nb = -(-N // target_blocks)
        max_nb = max(1, (8 * 1024 * 1024) // (16 * H * WC * 4))
        nb = min(nb, max_nb)
        num_blocks = -(-N // nb)
        Npad = num_blocks * nb

        roll_mode = _probe_roll()
        consts, op_nrefs = self._packed(H, W, nb)

        # NCHW -> lane-dense (N, H, W*Cin); concat s0|s1 along lanes (one 128-wide input)
        s0 = jnp.transpose(s0_nchw, (0, 2, 3, 1)).astype(jnp.float32).reshape(N, H, W * self.C_pp)
        s1 = jnp.transpose(s1_nchw, (0, 2, 3, 1)).astype(jnp.float32).reshape(N, H, W * self.C_p)
        s01 = jnp.concatenate([s0, s1], axis=-1)
        if Npad != N:
            pad = jnp.zeros((Npad - N,) + s01.shape[1:], s01.dtype)
            s01 = jnp.concatenate([s01, pad], axis=0)

        Lin = W * self.C_pp + W * self.C_p
        kernel = _build_cell_kernel(self._op_names, self._indices, self._concat,
                                    self._steps, H, W, C, nb, Lin, op_nrefs, roll_mode)

        in_specs = [pl.BlockSpec((nb, H, Lin), lambda b: (b, 0, 0))]
        for arr in consts:
            # constant blocks: index never changes, so they stay resident across the grid
            in_specs.append(pl.BlockSpec(arr.shape, _const_index_map(arr.ndim)))

        out = pl.pallas_call(
            kernel,
            out_shape=jax.ShapeDtypeStruct((Npad, H, n_cat * WC), jnp.float32),
            grid=(num_blocks,),
            in_specs=in_specs,
            out_specs=pl.BlockSpec((nb, H, n_cat * WC), lambda b: (b, 0, 0)),
            compiler_params=pltpu.CompilerParams(
                dimension_semantics=("parallel",)),     # batch blocks -> both v7x TCs
        )(s01, *consts)

        out = out[:N].reshape(N, H, n_cat, W, C)
        out = jnp.transpose(out, (0, 2, 4, 1, 3)).reshape(N, n_cat * C, H, W)
        return out

    # ---- forward (pure-JAX reference, used only for verification) ----
    def reference(self, s0_nchw, s1_nchw):
        s0 = jnp.transpose(s0_nchw, (0, 2, 3, 1)).astype(jnp.float32)
        s1 = jnp.transpose(s1_nchw, (0, 2, 3, 1)).astype(jnp.float32)
        s0 = _ref_relu_conv_bn(s0, self.pre0)
        s1 = _ref_relu_conv_bn(s1, self.pre1)
        states = [s0, s1]
        e = 0
        for i in range(self._steps):
            acc = None
            for j in range(e, e + i + 2):
                h = states[self._indices[j]]
                name = self._op_names[j]
                if name == "sep_conv_3x3":
                    h = _ref_sep_conv(h, self.op_params[j])
                elif name == "avg_pool_3x3":
                    h = _ref_avg_pool(h)
                elif name == "max_pool_3x3":
                    h = _ref_max_pool(h)
                elif name == "skip_connect":
                    pass
                else:
                    raise NotImplementedError(name)
                acc = h if acc is None else acc + h
            e += i + 2
            states.append(acc)
        out = jnp.concatenate([states[i] for i in self._concat], axis=-1)
        return jnp.transpose(out, (0, 3, 1, 2))


# ---------------------------------------------------------------------------
# Main
# ---------------------------------------------------------------------------

if __name__ == "__main__":
    key = jax.random.PRNGKey(0)
    kp, k0, k1 = jax.random.split(key, 3)

    # Small shapes; W * C = 128 so activations are exactly one lane-dense vreg row set.
    N, C_prev_prev, C_prev, C, H, W = 2, 8, 8, 16, 8, 8
    cell = PallasCell(GENOTYPE, C_prev_prev, C_prev, C,
                      reduction=False, reduction_prev=False, key=kp)

    s0 = jax.random.normal(k0, (N, C_prev_prev, H, W), jnp.float32)   # NCHW like PyTorch
    s1 = jax.random.normal(k1, (N, C_prev, H, W), jnp.float32)

    out = jax.block_until_ready(cell(s0, s1, drop_prob=0.2))
    assert out.shape == (N, cell.multiplier * C, H, W), out.shape
    assert bool(jnp.all(jnp.isfinite(out)))

    ref = jax.block_until_ready(cell.reference(s0, s1))
    max_err = float(jnp.max(jnp.abs(out - ref)))
    assert jnp.allclose(out, ref, atol=1e-2, rtol=1e-2), f"max abs err {max_err}"

    print("KERNEL_OK")
</pallas_src>

<mosaic_0001>
module attributes {stable_mosaic.version = 11 : i64} {
  func.func @kernel(%arg0: i32, %arg1: memref<1x8x128xf32, #tpu.memory_space<vmem>>, %arg2: memref<128x256xbf16, #tpu.memory_space<vmem>>, %arg3: memref<2x256xf32, #tpu.memory_space<vmem>>, %arg4: memref<9x8x128xf32, #tpu.memory_space<vmem>>, %arg5: memref<2x384x128xbf16, #tpu.memory_space<vmem>>, %arg6: memref<2x128x128xbf16, #tpu.memory_space<vmem>>, %arg7: memref<2x2x128xf32, #tpu.memory_space<vmem>>, %arg8: memref<2x384x128xbf16, #tpu.memory_space<vmem>>, %arg9: memref<2x128x128xbf16, #tpu.memory_space<vmem>>, %arg10: memref<2x2x128xf32, #tpu.memory_space<vmem>>, %arg11: memref<1x8x256xf32, #tpu.memory_space<vmem>>) attributes {dimension_semantics = [#tpu.dimension_semantics<parallel>], iteration_bounds = array<i64: 2>, scalar_prefetch = 0 : i64, scratch_operands = 0 : i64, tpu.core_type = #tpu.core_type<tc>, window_params = [{transform_indices = @transform_0, window_bounds = array<i64: 1, 8, 128>}, {pipeline_mode = #tpu.pipeline_mode<synchronous>, transform_indices = @transform_1, window_bounds = array<i64: 128, 256>}, {pipeline_mode = #tpu.pipeline_mode<synchronous>, transform_indices = @transform_2, window_bounds = array<i64: 2, 256>}, {pipeline_mode = #tpu.pipeline_mode<synchronous>, transform_indices = @transform_3, window_bounds = array<i64: 9, 8, 128>}, {pipeline_mode = #tpu.pipeline_mode<synchronous>, transform_indices = @transform_4, window_bounds = array<i64: 2, 384, 128>}, {pipeline_mode = #tpu.pipeline_mode<synchronous>, transform_indices = @transform_5, window_bounds = array<i64: 2, 128, 128>}, {pipeline_mode = #tpu.pipeline_mode<synchronous>, transform_indices = @transform_6, window_bounds = array<i64: 2, 2, 128>}, {pipeline_mode = #tpu.pipeline_mode<synchronous>, transform_indices = @transform_7, window_bounds = array<i64: 2, 384, 128>}, {pipeline_mode = #tpu.pipeline_mode<synchronous>, transform_indices = @transform_8, window_bounds = array<i64: 2, 128, 128>}, {pipeline_mode = #tpu.pipeline_mode<synchronous>, transform_indices = @transform_9, window_bounds = array<i64: 2, 2, 128>}, {transform_indices = @transform_10, window_bounds = array<i64: 1, 8, 256>}]} {
    %c0 = arith.constant 0 : index
    %c0_0 = arith.constant 0 : index
    %c0_1 = arith.constant 0 : index
    %0 = vector.load %arg4[%c0, %c0_0, %c0_1] : memref<9x8x128xf32, #tpu.memory_space<vmem>>, vector<1x8x128xf32>
    %1 = vector.shape_cast %0 : vector<1x8x128xf32> to vector<8x128xf32>
    %c1 = arith.constant 1 : index
    %c0_2 = arith.constant 0 : index
    %c0_3 = arith.constant 0 : index
    %2 = vector.load %arg4[%c1, %c0_2, %c0_3] : memref<9x8x128xf32, #tpu.memory_space<vmem>>, vector<1x8x128xf32>
    %3 = vector.shape_cast %2 : vector<1x8x128xf32> to vector<8x128xf32>
    %c2 = arith.constant 2 : index
    %c0_4 = arith.constant 0 : index
    %c0_5 = arith.constant 0 : index
    %4 = vector.load %arg4[%c2, %c0_4, %c0_5] : memref<9x8x128xf32, #tpu.memory_space<vmem>>, vector<1x8x128xf32>
    %5 = vector.shape_cast %4 : vector<1x8x128xf32> to vector<8x128xf32>
    %c3 = arith.constant 3 : index
    %c0_6 = arith.constant 0 : index
    %c0_7 = arith.constant 0 : index
    %6 = vector.load %arg4[%c3, %c0_6, %c0_7] : memref<9x8x128xf32, #tpu.memory_space<vmem>>, vector<1x8x128xf32>
    %7 = vector.shape_cast %6 : vector<1x8x128xf32> to vector<8x128xf32>
    %c4 = arith.constant 4 : index
    %c0_8 = arith.constant 0 : index
    %c0_9 = arith.constant 0 : index
    %8 = vector.load %arg4[%c4, %c0_8, %c0_9] : memref<9x8x128xf32, #tpu.memory_space<vmem>>, vector<1x8x128xf32>
    %9 = vector.shape_cast %8 : vector<1x8x128xf32> to vector<8x128xf32>
    %c5 = arith.constant 5 : index
    %c0_10 = arith.constant 0 : index
    %c0_11 = arith.constant 0 : index
    %10 = vector.load %arg4[%c5, %c0_10, %c0_11] : memref<9x8x128xf32, #tpu.memory_space<vmem>>, vector<1x8x128xf32>
    %11 = vector.shape_cast %10 : vector<1x8x128xf32> to vector<8x128xf32>
    %c6 = arith.constant 6 : index
    %c0_12 = arith.constant 0 : index
    %c0_13 = arith.constant 0 : index
    %12 = vector.load %arg4[%c6, %c0_12, %c0_13] : memref<9x8x128xf32, #tpu.memory_space<vmem>>, vector<1x8x128xf32>
    %13 = vector.shape_cast %12 : vector<1x8x128xf32> to vector<8x128xf32>
    %c7 = arith.constant 7 : index
    %c0_14 = arith.constant 0 : index
    %c0_15 = arith.constant 0 : index
    %14 = vector.load %arg4[%c7, %c0_14, %c0_15] : memref<9x8x128xf32, #tpu.memory_space<vmem>>, vector<1x8x128xf32>
    %15 = vector.shape_cast %14 : vector<1x8x128xf32> to vector<8x128xf32>
    %c8 = arith.constant 8 : index
    %c0_16 = arith.constant 0 : index
    %c0_17 = arith.constant 0 : index
    %16 = vector.load %arg4[%c8, %c0_16, %c0_17] : memref<9x8x128xf32, #tpu.memory_space<vmem>>, vector<1x8x128xf32>
    %17 = vector.shape_cast %16 : vector<1x8x128xf32> to vector<8x128xf32>
    %c0_18 = arith.constant 0 : index
    %c0_19 = arith.constant 0 : index
    %c0_20 = arith.constant 0 : index
    %18 = vector.load %arg1[%c0_18, %c0_19, %c0_20] : memref<1x8x128xf32, #tpu.memory_space<vmem>>, vector<1x8x128xf32>
    %19 = vector.shape_cast %18 : vector<1x8x128xf32> to vector<8x128xf32>
    %cst = arith.constant 0.000000e+00 : f32
    %20 = vector.broadcast %cst : f32 to vector<8x128xf32>
    %21 = arith.maximumf %19, %20 : vector<8x128xf32>
    %22 = arith.truncf %21 : vector<8x128xf32> to vector<8x128xbf16>
    %c0_21 = arith.constant 0 : index
    %c0_22 = arith.constant 0 : index
    %23 = vector.load %arg2[%c0_21, %c0_22] : memref<128x256xbf16, #tpu.memory_space<vmem>>, vector<128x256xbf16>
    %cst_23 = arith.constant dense<0.000000e+00> : vector<8x256xf32>
    %24 = tpu.matmul %22, %23, %cst_23 {dimension_numbers = #tpu.dot_dimension_numbers<[1], [0], [0], [1], [0, 0, 1, 1], [], []>} : vector<8x128xbf16>, vector<128x256xbf16>, vector<8x256xf32> -> vector<8x256xf32>
    %c0_24 = arith.constant 0 : index
    %c0_25 = arith.constant 0 : index
    %25 = vector.load %arg3[%c0_24, %c0_25] : memref<2x256xf32, #tpu.memory_space<vmem>>, vector<2x256xf32>
    %26 = vector.extract_strided_slice %25 {offsets = [0, 0], sizes = [1, 256], strides = [1, 1]} : vector<2x256xf32> to vector<1x256xf32>
    %27 = vector.broadcast %26 : vector<1x256xf32> to vector<8x256xf32>
    %28 = arith.mulf %24, %27 : vector<8x256xf32>
    %29 = vector.extract_strided_slice %25 {offsets = [1, 0], sizes = [1, 256], strides = [1, 1]} : vector<2x256xf32> to vector<1x256xf32>
    %30 = vector.broadcast %29 : vector<1x256xf32> to vector<8x256xf32>
    %31 = arith.addf %28, %30 : vector<8x256xf32>
    %32 = vector.extract_strided_slice %31 {offsets = [0, 0], sizes = [8, 128], strides = [1, 1]} : vector<8x256xf32> to vector<8x128xf32>
    %33 = vector.extract_strided_slice %31 {offsets = [0, 128], sizes = [8, 128], strides = [1, 1]} : vector<8x256xf32> to vector<8x128xf32>
    %cst_26 = arith.constant 0.000000e+00 : f32
    %34 = vector.broadcast %cst_26 : f32 to vector<8x128xf32>
    %35 = arith.maximumf %33, %34 : vector<8x128xf32>
    %cst_27 = arith.constant 0.000000e+00 : f32
    %36 = vector.broadcast %cst_27 : f32 to vector<1x128xf32>
    %37 = vector.extract_strided_slice %35 {offsets = [0, 0], sizes = [7, 128], strides = [1, 1]} : vector<8x128xf32> to vector<7x128xf32>
    %38 = tpu.concatenate %36, %37 in 0 : vector<1x128xf32>, vector<7x128xf32> -> vector<8x128xf32>
    %39 = arith.mulf %38, %1 : vector<8x128xf32>
    %cst_28 = arith.constant 0.000000e+00 : f32
    %40 = vector.broadcast %cst_28 : f32 to vector<1x128xf32>
    %41 = vector.extract_strided_slice %35 {offsets = [1, 0], sizes = [7, 128], strides = [1, 1]} : vector<8x128xf32> to vector<7x128xf32>
    %42 = tpu.concatenate %41, %40 in 0 : vector<7x128xf32>, vector<1x128xf32> -> vector<8x128xf32>
    %43 = arith.mulf %42, %3 : vector<8x128xf32>
    %44 = tpu.concatenate %39, %35, %43 in 1 : vector<8x128xf32>, vector<8x128xf32>, vector<8x128xf32> -> vector<8x384xf32>
    %45 = arith.truncf %44 : vector<8x384xf32> to vector<8x384xbf16>
    %c0_29 = arith.constant 0 : index
    %c0_30 = arith.constant 0 : index
    %c0_31 = arith.constant 0 : index
    %46 = vector.load %arg5[%c0_29, %c0_30, %c0_31] : memref<2x384x128xbf16, #tpu.memory_space<vmem>>, vector<1x384x128xbf16>
    %47 = vector.shape_cast %46 : vector<1x384x128xbf16> to vector<384x128xbf16>
    %cst_32 = arith.constant dense<0.000000e+00> : vector<8x128xf32>
    %48 = tpu.matmul %45, %47, %cst_32 {dimension_numbers = #tpu.dot_dimension_numbers<[1], [0], [0], [1], [0, 0, 1, 1], [], []>} : vector<8x384xbf16>, vector<384x128xbf16>, vector<8x128xf32> -> vector<8x128xf32>
    %49 = arith.truncf %48 : vector<8x128xf32> to vector<8x128xbf16>
    %c0_33 = arith.constant 0 : index
    %c0_34 = arith.constant 0 : index
    %c0_35 = arith.constant 0 : index
    %50 = vector.load %arg6[%c0_33, %c0_34, %c0_35] : memref<2x128x128xbf16, #tpu.memory_space<vmem>>, vector<1x128x128xbf16>
    %51 = vector.shape_cast %50 : vector<1x128x128xbf16> to vector<128x128xbf16>
    %cst_36 = arith.constant dense<0.000000e+00> : vector<8x128xf32>
    %52 = tpu.matmul %49, %51, %cst_36 {dimension_numbers = #tpu.dot_dimension_numbers<[1], [0], [0], [1], [0, 0, 1, 1], [], []>} : vector<8x128xbf16>, vector<128x128xbf16>, vector<8x128xf32> -> vector<8x128xf32>
    %c0_37 = arith.constant 0 : index
    %c0_38 = arith.constant 0 : index
    %c0_39 = arith.constant 0 : index
    %53 = vector.load %arg7[%c0_37, %c0_38, %c0_39] : memref<2x2x128xf32, #tpu.memory_space<vmem>>, vector<1x2x128xf32>
    %54 = vector.shape_cast %53 : vector<1x2x128xf32> to vector<2x128xf32>
    %55 = vector.extract_strided_slice %54 {offsets = [0, 0], sizes = [1, 128], strides = [1, 1]} : vector<2x128xf32> to vector<1x128xf32>
    %56 = vector.broadcast %55 : vector<1x128xf32> to vector<8x128xf32>
    %57 = arith.mulf %52, %56 : vector<8x128xf32>
    %58 = vector.extract_strided_slice %54 {offsets = [1, 0], sizes = [1, 128], strides = [1, 1]} : vector<2x128xf32> to vector<1x128xf32>
    %59 = vector.broadcast %58 : vector<1x128xf32> to vector<8x128xf32>
    %60 = arith.addf %57, %59 : vector<8x128xf32>
    %cst_40 = arith.constant 0.000000e+00 : f32
    %61 = vector.broadcast %cst_40 : f32 to vector<8x128xf32>
    %62 = arith.maximumf %60, %61 : vector<8x128xf32>
    %cst_41 = arith.constant 0.000000e+00 : f32
    %63 = vector.broadcast %cst_41 : f32 to vector<1x128xf32>
    %64 = vector.extract_strided_slice %62 {offsets = [0, 0], sizes = [7, 128], strides = [1, 1]} : vector<8x128xf32> to vector<7x128xf32>
    %65 = tpu.concatenate %63, %64 in 0 : vector<1x128xf32>, vector<7x128xf32> -> vector<8x128xf32>
    %66 = arith.mulf %65, %1 : vector<8x128xf32>
    %cst_42 = arith.constant 0.000000e+00 : f32
    %67 = vector.broadcast %cst_42 : f32 to vector<1x128xf32>
    %68 = vector.extract_strided_slice %62 {offsets = [1, 0], sizes = [7, 128], strides = [1, 1]} : vector<8x128xf32> to vector<7x128xf32>
    %69 = tpu.concatenate %68, %67 in 0 : vector<7x128xf32>, vector<1x128xf32> -> vector<8x128xf32>
    %70 = arith.mulf %69, %3 : vector<8x128xf32>
    %71 = tpu.concatenate %66, %62, %70 in 1 : vector<8x128xf32>, vector<8x128xf32>, vector<8x128xf32> -> vector<8x384xf32>
    %72 = arith.truncf %71 : vector<8x384xf32> to vector<8x384xbf16>
    %c1_43 = arith.constant 1 : index
    %c0_44 = arith.constant 0 : index
    %c0_45 = arith.constant 0 : index
    %73 = vector.load %arg5[%c1_43, %c0_44, %c0_45] : memref<2x384x128xbf16, #tpu.memory_space<vmem>>, vector<1x384x128xbf16>
    %74 = vector.shape_cast %73 : vector<1x384x128xbf16> to vector<384x128xbf16>
    %cst_46 = arith.constant dense<0.000000e+00> : vector<8x128xf32>
    %75 = tpu.matmul %72, %74, %cst_46 {dimension_numbers = #tpu.dot_dimension_numbers<[1], [0], [0], [1], [0, 0, 1, 1], [], []>} : vector<8x384xbf16>, vector<384x128xbf16>, vector<8x128xf32> -> vector<8x128xf32>
    %76 = arith.truncf %75 : vector<8x128xf32> to vector<8x128xbf16>
    %c1_47 = arith.constant 1 : index
    %c0_48 = arith.constant 0 : index
    %c0_49 = arith.constant 0 : index
    %77 = vector.load %arg6[%c1_47, %c0_48, %c0_49] : memref<2x128x128xbf16, #tpu.memory_space<vmem>>, vector<1x128x128xbf16>
    %78 = vector.shape_cast %77 : vector<1x128x128xbf16> to vector<128x128xbf16>
    %cst_50 = arith.constant dense<0.000000e+00> : vector<8x128xf32>
    %79 = tpu.matmul %76, %78, %cst_50 {dimension_numbers = #tpu.dot_dimension_numbers<[1], [0], [0], [1], [0, 0, 1, 1], [], []>} : vector<8x128xbf16>, vector<128x128xbf16>, vector<8x128xf32> -> vector<8x128xf32>
    %c1_51 = arith.constant 1 : index
    %c0_52 = arith.constant 0 : index
    %c0_53 = arith.constant 0 : index
    %80 = vector.load %arg7[%c1_51, %c0_52, %c0_53] : memref<2x2x128xf32, #tpu.memory_space<vmem>>, vector<1x2x128xf32>
    %81 = vector.shape_cast %80 : vector<1x2x128xf32> to vector<2x128xf32>
    %82 = vector.extract_strided_slice %81 {offsets = [0, 0], sizes = [1, 128], strides = [1, 1]} : vector<2x128xf32> to vector<1x128xf32>
    %83 = vector.broadcast %82 : vector<1x128xf32> to vector<8x128xf32>
    %84 = arith.mulf %79, %83 : vector<8x128xf32>
    %85 = vector.extract_strided_slice %81 {offsets = [1, 0], sizes = [1, 128], strides = [1, 1]} : vector<2x128xf32> to vector<1x128xf32>
    %86 = vector.broadcast %85 : vector<1x128xf32> to vector<8x128xf32>
    %87 = arith.addf %84, %86 : vector<8x128xf32>
    %88 = arith.addf %87, %32 : vector<8x128xf32>
    %cst_54 = arith.constant 0.000000e+00 : f32
    %89 = vector.broadcast %cst_54 : f32 to vector<1x128xf32>
    %90 = vector.extract_strided_slice %32 {offsets = [0, 0], sizes = [7, 128], strides = [1, 1]} : vector<8x128xf32> to vector<7x128xf32>
    %91 = tpu.concatenate %89, %90 in 0 : vector<1x128xf32>, vector<7x128xf32> -> vector<8x128xf32>
    %92 = arith.mulf %91, %1 : vector<8x128xf32>
    %93 = arith.addf %32, %92 : vector<8x128xf32>
    %cst_55 = arith.constant 0.000000e+00 : f32
    %94 = vector.broadcast %cst_55 : f32 to vector<1x128xf32>
    %95 = vector.extract_strided_slice %32 {offsets = [1, 0], sizes = [7, 128], strides = [1, 1]} : vector<8x128xf32> to vector<7x128xf32>
    %96 = tpu.concatenate %95, %94 in 0 : vector<7x128xf32>, vector<1x128xf32> -> vector<8x128xf32>
    %97 = arith.mulf %96, %3 : vector<8x128xf32>
    %98 = arith.addf %93, %97 : vector<8x128xf32>
    %cst_56 = arith.constant 0.000000e+00 : f32
    %99 = vector.broadcast %cst_56 : f32 to vector<8x16xf32>
    %100 = vector.extract_strided_slice %98 {offsets = [0, 0], sizes = [8, 112], strides = [1, 1]} : vector<8x128xf32> to vector<8x112xf32>
    %101 = tpu.concatenate %99, %100 in 1 : vector<8x16xf32>, vector<8x112xf32> -> vector<8x128xf32>
    %102 = arith.mulf %101, %5 : vector<8x128xf32>
    %103 = arith.addf %98, %102 : vector<8x128xf32>
    %cst_57 = arith.constant 0.000000e+00 : f32
    %104 = vector.broadcast %cst_57 : f32 to vector<8x16xf32>
    %105 = vector.extract_strided_slice %98 {offsets = [0, 16], sizes = [8, 112], strides = [1, 1]} : vector<8x128xf32> to vector<8x112xf32>
    %106 = tpu.concatenate %105, %104 in 1 : vector<8x112xf32>, vector<8x16xf32> -> vector<8x128xf32>
    %107 = arith.mulf %106, %7 : vector<8x128xf32>
    %108 = arith.addf %103, %107 : vector<8x128xf32>
    %109 = arith.mulf %108, %9 : vector<8x128xf32>
    %cst_58 = arith.constant 0.000000e+00 : f32
    %110 = vector.broadcast %cst_58 : f32 to vector<8x16xf32>
    %111 = vector.extract_strided_slice %33 {offsets = [0, 0], sizes = [8, 112], strides = [1, 1]} : vector<8x128xf32> to vector<8x112xf32>
    %112 = tpu.concatenate %110, %111 in 1 : vector<8x16xf32>, vector<8x112xf32> -> vector<8x128xf32>
    %113 = arith.addf %112, %15 : vector<8x128xf32>
    %cst_59 = arith.constant 0.000000e+00 : f32
    %114 = vector.broadcast %cst_59 : f32 to vector<8x16xf32>
    %115 = vector.extract_strided_slice %33 {offsets = [0, 16], sizes = [8, 112], strides = [1, 1]} : vector<8x128xf32> to vector<8x112xf32>
    %116 = tpu.concatenate %115, %114 in 1 : vector<8x112xf32>, vector<8x16xf32> -> vector<8x128xf32>
    %117 = arith.addf %116, %17 : vector<8x128xf32>
    %118 = arith.maximumf %113, %117 : vector<8x128xf32>
    %119 = arith.maximumf %33, %118 : vector<8x128xf32>
    %cst_60 = arith.constant 0.000000e+00 : f32
    %120 = vector.broadcast %cst_60 : f32 to vector<1x128xf32>
    %121 = vector.extract_strided_slice %119 {offsets = [0, 0], sizes = [7, 128], strides = [1, 1]} : vector<8x128xf32> to vector<7x128xf32>
    %122 = tpu.concatenate %120, %121 in 0 : vector<1x128xf32>, vector<7x128xf32> -> vector<8x128xf32>
    %123 = arith.addf %122, %11 : vector<8x128xf32>
    %cst_61 = arith.constant 0.000000e+00 : f32
    %124 = vector.broadcast %cst_61 : f32 to vector<1x128xf32>
    %125 = vector.extract_strided_slice %119 {offsets = [1, 0], sizes = [7, 128], strides = [1, 1]} : vector<8x128xf32> to vector<7x128xf32>
    %126 = tpu.concatenate %125, %124 in 0 : vector<7x128xf32>, vector<1x128xf32> -> vector<8x128xf32>
    %127 = arith.addf %126, %13 : vector<8x128xf32>
    %128 = arith.maximumf %123, %127 : vector<8x128xf32>
    %129 = arith.maximumf %119, %128 : vector<8x128xf32>
    %130 = arith.addf %109, %129 : vector<8x128xf32>
    %cst_62 = arith.constant 0.000000e+00 : f32
    %131 = vector.broadcast %cst_62 : f32 to vector<8x128xf32>
    %132 = arith.maximumf %88, %131 : vector<8x128xf32>
    %cst_63 = arith.constant 0.000000e+00 : f32
    %133 = vector.broadcast %cst_63 : f32 to vector<1x128xf32>
    %134 = vector.extract_strided_slice %132 {offsets = [0, 0], sizes = [7, 128], strides = [1, 1]} : vector<8x128xf32> to vector<7x128xf32>
    %135 = tpu.concatenate %133, %134 in 0 : vector<1x128xf32>, vector<7x128xf32> -> vector<8x128xf32>
    %136 = arith.mulf %135, %1 : vector<8x128xf32>
    %cst_64 = arith.constant 0.000000e+00 : f32
    %137 = vector.broadcast %cst_64 : f32 to vector<1x128xf32>
    %138 = vector.extract_strided_slice %132 {offsets = [1, 0], sizes = [7, 128], strides = [1, 1]} : vector<8x128xf32> to vector<7x128xf32>
    %139 = tpu.concatenate %138, %137 in 0 : vector<7x128xf32>, vector<1x128xf32> -> vector<8x128xf32>
    %140 = arith.mulf %139, %3 : vector<8x128xf32>
    %141 = tpu.concatenate %136, %132, %140 in 1 : vector<8x128xf32>, vector<8x128xf32>, vector<8x128xf32> -> vector<8x384xf32>
    %142 = arith.truncf %141 : vector<8x384xf32> to vector<8x384xbf16>
    %c0_65 = arith.constant 0 : index
    %c0_66 = arith.constant 0 : index
    %c0_67 = arith.constant 0 : index
    %143 = vector.load %arg8[%c0_65, %c0_66, %c0_67] : memref<2x384x128xbf16, #tpu.memory_space<vmem>>, vector<1x384x128xbf16>
    %144 = vector.shape_cast %143 : vector<1x384x128xbf16> to vector<384x128xbf16>
    %cst_68 = arith.constant dense<0.000000e+00> : vector<8x128xf32>
    %145 = tpu.matmul %142, %144, %cst_68 {dimension_numbers = #tpu.dot_dimension_numbers<[1], [0], [0], [1], [0, 0, 1, 1], [], []>} : vector<8x384xbf16>, vector<384x128xbf16>, vector<8x128xf32> -> vector<8x128xf32>
    %146 = arith.truncf %145 : vector<8x128xf32> to vector<8x128xbf16>
    %c0_69 = arith.constant 0 : index
    %c0_70 = arith.constant 0 : index
    %c0_71 = arith.constant 0 : index
    %147 = vector.load %arg9[%c0_69, %c0_70, %c0_71] : memref<2x128x128xbf16, #tpu.memory_space<vmem>>, vector<1x128x128xbf16>
    %148 = vector.shape_cast %147 : vector<1x128x128xbf16> to vector<128x128xbf16>
    %cst_72 = arith.constant dense<0.000000e+00> : vector<8x128xf32>
    %149 = tpu.matmul %146, %148, %cst_72 {dimension_numbers = #tpu.dot_dimension_numbers<[1], [0], [0], [1], [0, 0, 1, 1], [], []>} : vector<8x128xbf16>, vector<128x128xbf16>, vector<8x128xf32> -> vector<8x128xf32>
    %c0_73 = arith.constant 0 : index
    %c0_74 = arith.constant 0 : index
    %c0_75 = arith.constant 0 : index
    %150 = vector.load %arg10[%c0_73, %c0_74, %c0_75] : memref<2x2x128xf32, #tpu.memory_space<vmem>>, vector<1x2x128xf32>
    %151 = vector.shape_cast %150 : vector<1x2x128xf32> to vector<2x128xf32>
    %152 = vector.extract_strided_slice %151 {offsets = [0, 0], sizes = [1, 128], strides = [1, 1]} : vector<2x128xf32> to vector<1x128xf32>
    %153 = vector.broadcast %152 : vector<1x128xf32> to vector<8x128xf32>
    %154 = arith.mulf %149, %153 : vector<8x128xf32>
    %155 = vector.extract_strided_slice %151 {offsets = [1, 0], sizes = [1, 128], strides = [1, 1]} : vector<2x128xf32> to vector<1x128xf32>
    %156 = vector.broadcast %155 : vector<1x128xf32> to vector<8x128xf32>
    %157 = arith.addf %154, %156 : vector<8x128xf32>
    %cst_76 = arith.constant 0.000000e+00 : f32
    %158 = vector.broadcast %cst_76 : f32 to vector<8x128xf32>
    %159 = arith.maximumf %157, %158 : vector<8x128xf32>
    %cst_77 = arith.constant 0.000000e+00 : f32
    %160 = vector.broadcast %cst_77 : f32 to vector<1x128xf32>
    %161 = vector.extract_strided_slice %159 {offsets = [0, 0], sizes = [7, 128], strides = [1, 1]} : vector<8x128xf32> to vector<7x128xf32>
    %162 = tpu.concatenate %160, %161 in 0 : vector<1x128xf32>, vector<7x128xf32> -> vector<8x128xf32>
    %163 = arith.mulf %162, %1 : vector<8x128xf32>
    %cst_78 = arith.constant 0.000000e+00 : f32
    %164 = vector.broadcast %cst_78 : f32 to vector<1x128xf32>
    %165 = vector.extract_strided_slice %159 {offsets = [1, 0], sizes = [7, 128], strides = [1, 1]} : vector<8x128xf32> to vector<7x128xf32>
    %166 = tpu.concatenate %165, %164 in 0 : vector<7x128xf32>, vector<1x128xf32> -> vector<8x128xf32>
    %167 = arith.mulf %166, %3 : vector<8x128xf32>
    %168 = tpu.concatenate %163, %159, %167 in 1 : vector<8x128xf32>, vector<8x128xf32>, vector<8x128xf32> -> vector<8x384xf32>
    %169 = arith.truncf %168 : vector<8x384xf32> to vector<8x384xbf16>
    %c1_79 = arith.constant 1 : index
    %c0_80 = arith.constant 0 : index
    %c0_81 = arith.constant 0 : index
    %170 = vector.load %arg8[%c1_79, %c0_80, %c0_81] : memref<2x384x128xbf16, #tpu.memory_space<vmem>>, vector<1x384x128xbf16>
    %171 = vector.shape_cast %170 : vector<1x384x128xbf16> to vector<384x128xbf16>
    %cst_82 = arith.constant dense<0.000000e+00> : vector<8x128xf32>
    %172 = tpu.matmul %169, %171, %cst_82 {dimension_numbers = #tpu.dot_dimension_numbers<[1], [0], [0], [1], [0, 0, 1, 1], [], []>} : vector<8x384xbf16>, vector<384x128xbf16>, vector<8x128xf32> -> vector<8x128xf32>
    %173 = arith.truncf %172 : vector<8x128xf32> to vector<8x128xbf16>
    %c1_83 = arith.constant 1 : index
    %c0_84 = arith.constant 0 : index
    %c0_85 = arith.constant 0 : index
    %174 = vector.load %arg9[%c1_83, %c0_84, %c0_85] : memref<2x128x128xbf16, #tpu.memory_space<vmem>>, vector<1x128x128xbf16>
    %175 = vector.shape_cast %174 : vector<1x128x128xbf16> to vector<128x128xbf16>
    %cst_86 = arith.constant dense<0.000000e+00> : vector<8x128xf32>
    %176 = tpu.matmul %173, %175, %cst_86 {dimension_numbers = #tpu.dot_dimension_numbers<[1], [0], [0], [1], [0, 0, 1, 1], [], []>} : vector<8x128xbf16>, vector<128x128xbf16>, vector<8x128xf32> -> vector<8x128xf32>
    %c1_87 = arith.constant 1 : index
    %c0_88 = arith.constant 0 : index
    %c0_89 = arith.constant 0 : index
    %177 = vector.load %arg10[%c1_87, %c0_88, %c0_89] : memref<2x2x128xf32, #tpu.memory_space<vmem>>, vector<1x2x128xf32>
    %178 = vector.shape_cast %177 : vector<1x2x128xf32> to vector<2x128xf32>
    %179 = vector.extract_strided_slice %178 {offsets = [0, 0], sizes = [1, 128], strides = [1, 1]} : vector<2x128xf32> to vector<1x128xf32>
    %180 = vector.broadcast %179 : vector<1x128xf32> to vector<8x128xf32>
    %181 = arith.mulf %176, %180 : vector<8x128xf32>
    %182 = vector.extract_strided_slice %178 {offsets = [1, 0], sizes = [1, 128], strides = [1, 1]} : vector<2x128xf32> to vector<1x128xf32>
    %183 = vector.broadcast %182 : vector<1x128xf32> to vector<8x128xf32>
    %184 = arith.addf %181, %183 : vector<8x128xf32>
    %185 = arith.addf %130, %184 : vector<8x128xf32>
    %186 = tpu.concatenate %88, %185 in 1 : vector<8x128xf32>, vector<8x128xf32> -> vector<8x256xf32>
    %187 = vector.shape_cast %186 : vector<8x256xf32> to vector<1x8x256xf32>
    %c0_90 = arith.constant 0 : index
    %c0_91 = arith.constant 0 : index
    %c0_92 = arith.constant 0 : index
    %188 = vector.load %arg11[%c0_90, %c0_91, %c0_92] : memref<1x8x256xf32, #tpu.memory_space<vmem>>, vector<1x8x256xf32>
    tpu.vector_store %arg11[%c0_90, %c0_91, %c0_92], %187 {strides = array<i32>} : memref<1x8x256xf32, #tpu.memory_space<vmem>>, vector<1x8x256xf32>,
    return
  }
  func.func @transform_0(%arg0: i32) -> (i32, i32, i32) {
    %c0_i32 = arith.constant 0 : i32
    %c0_i32_0 = arith.constant 0 : i32
    %c0_i32_1 = arith.constant 0 : i32
    return %arg0, %c0_i32, %c0_i32_0 : i32, i32, i32
  }
  func.func @transform_1(%arg0: i32) -> (i32, i32) {
    %c0_i32 = arith.constant 0 : i32
    %c0_i32_0 = arith.constant 0 : i32
    %c0_i32_1 = arith.constant 0 : i32
    return %c0_i32, %c0_i32_0 : i32, i32
  }
  func.func @transform_2(%arg0: i32) -> (i32, i32) {
    %c0_i32 = arith.constant 0 : i32
    %c0_i32_0 = arith.constant 0 : i32
    %c0_i32_1 = arith.constant 0 : i32
    return %c0_i32, %c0_i32_0 : i32, i32
  }
  func.func @transform_3(%arg0: i32) -> (i32, i32, i32) {
    %c0_i32 = arith.constant 0 : i32
    %c0_i32_0 = arith.constant 0 : i32
    %c0_i32_1 = arith.constant 0 : i32
    %c0_i32_2 = arith.constant 0 : i32
    return %c0_i32, %c0_i32_0, %c0_i32_1 : i32, i32, i32
  }
  func.func @transform_4(%arg0: i32) -> (i32, i32, i32) {
    %c0_i32 = arith.constant 0 : i32
    %c0_i32_0 = arith.constant 0 : i32
    %c0_i32_1 = arith.constant 0 : i32
    %c0_i32_2 = arith.constant 0 : i32
    return %c0_i32, %c0_i32_0, %c0_i32_1 : i32, i32, i32
  }
  func.func @transform_5(%arg0: i32) -> (i32, i32, i32) {
    %c0_i32 = arith.constant 0 : i32
    %c0_i32_0 = arith.constant 0 : i32
    %c0_i32_1 = arith.constant 0 : i32
    %c0_i32_2 = arith.constant 0 : i32
    return %c0_i32, %c0_i32_0, %c0_i32_1 : i32, i32, i32
  }
  func.func @transform_6(%arg0: i32) -> (i32, i32, i32) {
    %c0_i32 = arith.constant 0 : i32
    %c0_i32_0 = arith.constant 0 : i32
    %c0_i32_1 = arith.constant 0 : i32
    %c0_i32_2 = arith.constant 0 : i32
    return %c0_i32, %c0_i32_0, %c0_i32_1 : i32, i32, i32
  }
  func.func @transform_7(%arg0: i32) -> (i32, i32, i32) {
    %c0_i32 = arith.constant 0 : i32
    %c0_i32_0 = arith.constant 0 : i32
    %c0_i32_1 = arith.constant 0 : i32
    %c0_i32_2 = arith.constant 0 : i32
    return %c0_i32, %c0_i32_0, %c0_i32_1 : i32, i32, i32
  }
  func.func @transform_8(%arg0: i32) -> (i32, i32, i32) {
    %c0_i32 = arith.constant 0 : i32
    %c0_i32_0 = arith.constant 0 : i32
    %c0_i32_1 = arith.constant 0 : i32
    %c0_i32_2 = arith.constant 0 : i32
    return %c0_i32, %c0_i32_0, %c0_i32_1 : i32, i32, i32
  }
  func.func @transform_9(%arg0: i32) -> (i32, i32, i32) {
    %c0_i32 = arith.constant 0 : i32
    %c0_i32_0 = arith.constant 0 : i32
    %c0_i32_1 = arith.constant 0 : i32
    %c0_i32_2 = arith.constant 0 : i32
    return %c0_i32, %c0_i32_0, %c0_i32_1 : i32, i32, i32
  }
  func.func @transform_10(%arg0: i32) -> (i32, i32, i32) {
    %c0_i32 = arith.constant 0 : i32
    %c0_i32_0 = arith.constant 0 : i32
    %c0_i32_1 = arith.constant 0 : i32
    return %arg0, %c0_i32, %c0_i32_0 : i32, i32, i32
  }
}

</mosaic_0001>

<bundles_post_ra>
// kernel: tpu_custom_call.1
= control target key start
LH: loop header
LB: loop body
LE: loop exit
PB: predicated region body
PF: predicated region fallthrough
CT: control target
= control target key end

     0   :  { %s4028_s0 = inlined_call_operand.hbm [shape: f32[2,8,128], index: 0, kind: input, shape index: {}]   ;;  %s4029_s1 = inlined_call_operand.hbm [shape: bf16[128,256], index: 1, kind: input, shape index: {}]   ;;  %s4030_s2 = inlined_call_operand.hbm [shape: f32[2,256], index: 2, kind: input, shape index: {}]   ;;  %s4031_s3 = inlined_call_operand.hbm [shape: f32[9,8,128], index: 3, kind: input, shape index: {}]   ;;  %s4032_s4 = inlined_call_operand.hbm [shape: bf16[2,384,128], index: 4, kind: input, shape index: {}]   ;;  %s4033_s5 = inlined_call_operand.hbm [shape: bf16[2,128,128], index: 5, kind: input, shape index: {}]   ;;  %s4034_s6 = inlined_call_operand.vmem [shape: f32[2,2,128], index: 6, kind: input, shape index: {}]   ;;  %s4035_s7 = inlined_call_operand.hbm [shape: bf16[2,384,128], index: 7, kind: input, shape index: {}]   ;;  %s4036_s8 = inlined_call_operand.hbm [shape: bf16[2,128,128], index: 8, kind: input, shape index: {}]   ;;  %s4037_s9 = inlined_call_operand.vmem [shape: f32[2,2,128], index: 9, kind: input, shape index: {}]   ;;  %s4038_s10 = inlined_call_operand.hbm [shape: f32[2,8,256], index: 10, kind: output, shape index: {}]  }
   0x1   :  { %4043 = sst [smem:[#allocation23_spill]] %s4029_s1 }
   0x2   :  { %4044 = sst [smem:[#allocation24_spill]] %s4030_s2 }
   0x3   :  { %4045 = sst [smem:[#allocation25_spill]] %s4031_s3 }
   0x4   :  { %4046 = sst [smem:[#allocation26_spill]] %s4032_s4 }
   0x5   :  { %4047 = sst [smem:[#allocation27_spill]] %s4033_s5 }
   0x6   :  { %15 = vsyncpa [#allocation3], 0 }
   0x7   :  { %17 = vsyncpa [#allocation3 + $0x1], 0 }
   0x8   :  { %18 = vsyncpa [#allocation6], 0 }
   0x9   :  { %19 = vsyncpa [#allocation9], 0 }
   0xa   :  { %20 = vsyncpa [#allocation12], 0 }
   0xb   :  { %21 = vsyncpa [#allocation15], 0 }
   0xc   :  { %22 = vsyncpa [#allocation4], 0 }
   0xd   :  { %24 = vsyncpa [#allocation4 + $0x1], 0  ;;  %s3632_s13 = smov 0   ;;  %s3634_s14 = smov 0  }
   0xe   :  { %s3636_s15 = smov 0   ;;  %s3638_s16 = smov 0  }
   0xf LB: > { %s3559_s17 = smov [#allocation5]   ;;  %s3653_s19 = sadd.s32 4294967295, %s3557_s16   ;;  %s3557_s16 = sphi %s3638_s16, %s4077_s16   ;;  %s3553_s15 = sphi %s3636_s15, %s4076_s15   ;;  %s3549_s14 = sphi %s3634_s14, %s4075_s14   ;;  %s3545_s13 = sphi %s3632_s13, %s4074_s13  }
  0x10   : > { %s288_s18 = sshll.u32 %s3559_s17, 4  ;;  %p2496_p0 = scmp.ge.s32.totalorder %s3557_s16, 1  ;;  %s289_s18 = int_to_ptr.vmem [resolvable:$true] %s288_s18 }
  0x11   : > { %p4039_p1 = scmp.eq.s32.totalorder %s3653_s19, 0  ;;  %p276_p2 = scmp.lt.s32.totalorder %s3557_s16, 3 }
  0x12   : > { %s3560_s21 = smov [#allocation8]   ;;  %s3561_s24 = smov [#allocation11]  }
  0x13   : > { %p3658_p3 = pnand %p2496_p0, %p276_p2  ;;  %s312_s22 = sshll.u32 %s3560_s21, 4  ;;  %s313_s22 = int_to_ptr.vmem [resolvable:$true] %s312_s22 }
  0x14   : > { %s338_s25 = sshll.u32 %s3561_s24, 4  ;;  %s3278_s27 = scalar_lea.vmem %s289_s18, 2048  ;;  %s339_s25 = int_to_ptr.vmem [resolvable:$true] %s338_s25 }
  0x15   : > { %s4048_s20 = scalar_select %p3658_p3, 1, 0 }
  0x16   : > { %p3021_p5 = pneg %p3658_p3  ;;  %p3279_p8 = scmp.ne.s32.totalorder %s289_s18, %s3278_s27 }
  0x17   : > { %p3286_p11 = scmp.lt.s32.totalorder %s289_s18, %s289_s18  ;;  %p3287_p12 = scmp.lt.s32.totalorder %s3278_s27, %s3278_s27 }
  0x18   : > { %p3667_p6 = pnand %p3021_p5, %p4039_p1 }
  0x19   : > { %p3288_p13 = por %p3287_p12, %p3286_p11 }
  0x1a   : > { %p3673_p7 = pneg %p3667_p6 }
  0x1c   : > { %p3281_p9 = pnand %p3279_p8, %p3673_p7 }
  0x1e   : > { %p3282_p10 = pneg %p3281_p9 }
  0x20   : > { %p3289_p0 = pnand %p3288_p13, %p3282_p10 }
  0x22   : > { %3292 = shalt.err (!%p3289_p0)
}
  0x23   : > { %s3562_s28 = smov 128   ;;  %s3563_s29 = smov 8  }
  0x24   : > { %s4051_s1 = sld [smem:[#allocation23_spill]]  ;;  %s3304_s12 = scalar_lea.vmem %s313_s22, 1152 }
  0x25   : > { %p3305_p2 = scmp.ne.s32.totalorder %s313_s22, %s3304_s12  ;;  %p3312_p9 = scmp.lt.s32.totalorder %s313_s22, %s313_s22 }
  0x26   : > { %p3313_p4 = scmp.lt.s32.totalorder %s3304_s12, %s3304_s12 }
  0x27   : > { %p3307_p5 = pnand %p3305_p2, %p3673_p7 }
  0x28   : > { %p3314_p1 = por %p3313_p4, %p3312_p9 }
  0x29   : > { %p3308_p8 = pneg %p3307_p5 }
  0x2a   : > { %3024 = dma.hbm_to_vmem [thread:$0]  (!%p3667_p6), %s4051_s1, 2048, %s289_s18, [#allocation6], %s3562_s28, %s3562_s28, %s3563_s29  }
  0x2b   : > { %p3315_p11 = pnand %p3314_p1, %p3308_p8 }
  0x2d   : > { %3318 = shalt.err (!%p3315_p11)
}
  0x2e   : > { %s4052_s3 = sld [smem:[#allocation25_spill]]  ;;  %s3330_s24 = scalar_lea.vmem %s339_s25, 2048 }
  0x2f   : > { %p3331_p10 = scmp.ne.s32.totalorder %s339_s25, %s3330_s24  ;;  %p3338_p0 = scmp.lt.s32.totalorder %s339_s25, %s339_s25 }
  0x30   : > { %p3339_p2 = scmp.lt.s32.totalorder %s3330_s24, %s3330_s24 }
  0x31   : > { %p3333_p12 = pnand %p3331_p10, %p3673_p7 }
  0x32   : > { %p3340_p5 = por %p3339_p2, %p3338_p0 }
  0x33   : > { %p3334_p13 = pneg %p3333_p12 }
  0x34   : > { %3030 = dma.hbm_to_vmem [thread:$0]  (!%p3667_p6), %s4052_s3, 1152, %s313_s22, [#allocation9], %s3562_s28, %s3562_s28, %s3563_s29  }
  0x35   : > { %p3341_p3 = pnand %p3340_p5, %p3334_p13 }
  0x37   : > { %3344 = shalt.err (!%p3341_p3)
}
  0x38   : > { %s3564_s18 = smov 64   ;;  %s3565_s27 = smov 4  }
  0x39   : > { %s4053_s5 = sld [smem:[#allocation27_spill]]  ;;  %s3566_s29 = smov [#allocation7]  }
  0x3a   : > { %s302_s30 = sshll.u32 %s3566_s29, 4  ;;  %s3567_s11 = smov [#allocation10]   ;;  %s303_s30 = int_to_ptr.vmem [resolvable:$true] %s302_s30 }
  0x3b   : > { %s325_s12 = sshll.u32 %s3567_s11, 4  ;;  %s3356_s17 = scalar_lea.vmem %s303_s30, 64  ;;  %s326_s12 = int_to_ptr.vmem [resolvable:$true] %s325_s12 }
  0x3c   : > { %p3357_p1 = scmp.ne.s32.totalorder %s303_s30, %s3356_s17  ;;  %p3364_p8 = scmp.lt.s32.totalorder %s303_s30, %s303_s30 }
  0x3d   : > { %p3365_p9 = scmp.lt.s32.totalorder %s3356_s17, %s3356_s17 }
  0x3e   : > { %p3359_p3 = pnand %p3357_p1, %p3673_p7 }
  0x3f   : > { %3036 = dma.hbm_to_vmem [thread:$0]  (!%p3667_p6), %s4053_s5, 2048, %s339_s25, [#allocation12], %s3564_s18, %s3564_s18, %s3565_s27  }
  0x40   : > { %p3360_p4 = pneg %p3359_p3  ;;  %p3366_p11 = por %p3365_p9, %p3364_p8 }
  0x42   : > { %p3367_p10 = pnand %p3366_p11, %p3360_p4 }
  0x44   : > { %3370 = shalt.err (!%p3367_p10)
}
  0x45   : > { %s4054_s2 = sld [smem:[#allocation24_spill]]  ;;  %s3382_s25 = scalar_lea.vmem %s326_s12, 6144 }
  0x46   : > { %p3383_p12 = scmp.ne.s32.totalorder %s326_s12, %s3382_s25  ;;  %p3390_p2 = scmp.lt.s32.totalorder %s326_s12, %s326_s12 }
  0x47   : > { %p3391_p5 = scmp.lt.s32.totalorder %s3382_s25, %s3382_s25 }
  0x48   : > { %p3385_p13 = pnand %p3383_p12, %p3673_p7 }
  0x49   : > { %p3392_p1 = por %p3391_p5, %p3390_p2 }
  0x4a   : > { %p3386_p0 = pneg %p3385_p13 }
  0x4b   : > { %3027 = dma.hbm_to_vmem [thread:$0]  (!%p3667_p6), %s4054_s2, 64, %s303_s30, [#allocation6]  }
  0x4c   : > { %p3393_p3 = pnand %p3392_p1, %p3386_p0 }
  0x4e   : > { %3396 = shalt.err (!%p3393_p3)
}
  0x4f   : > { %s4055_s4 = sld [smem:[#allocation26_spill]]  ;;  %s3568_s29 = smov [#allocation13]  }
  0x50   : > { %s354_s30 = sshll.u32 %s3568_s29, 4  ;;  %s3569_s11 = smov [#allocation14]   ;;  %s355_s30 = int_to_ptr.vmem [resolvable:$true] %s354_s30 }
  0x51   : > { %s367_s17 = sshll.u32 %s3569_s11, 4  ;;  %s3408_s21 = scalar_lea.vmem %s355_s30, 6144  ;;  %s368_s17 = int_to_ptr.vmem [resolvable:$true] %s367_s17 }
  0x52   : > { %p3409_p4 = scmp.ne.s32.totalorder %s355_s30, %s3408_s21  ;;  %p3416_p11 = scmp.lt.s32.totalorder %s355_s30, %s355_s30 }
  0x53   : > { %p3417_p10 = scmp.lt.s32.totalorder %s3408_s21, %s3408_s21 }
  0x54   : > { %p3411_p8 = pnand %p3409_p4, %p3673_p7 }
  0x55   : > { %3033 = dma.hbm_to_vmem [thread:$0]  (!%p3667_p6), %s4055_s4, 6144, %s326_s12, [#allocation9], %s3564_s18, %s3564_s18, %s3565_s27  }
  0x56   : > { %p3412_p9 = pneg %p3411_p8  ;;  %p3418_p12 = por %p3417_p10, %p3416_p11 }
  0x58   : > { %p3419_p13 = pnand %p3418_p12, %p3412_p9 }
  0x5a   : > { %3422 = shalt.err (!%p3419_p13)
}
  0x5b   : > { %3039 = dma.hbm_to_vmem [thread:$0]  (!%p3667_p6), %s4035_s7, 6144, %s355_s30, [#allocation12], %s3564_s18, %s3564_s18, %s3565_s27  }
  0x5c   : > { %s3434_s25 = scalar_lea.vmem %s368_s17, 2048  ;;  %p3442_p1 = scmp.lt.s32.totalorder %s368_s17, %s368_s17 }
  0x5d   : > { %p3435_p0 = scmp.ne.s32.totalorder %s368_s17, %s3434_s25  ;;  %p3443_p3 = scmp.lt.s32.totalorder %s3434_s25, %s3434_s25 }
  0x5f   : > { %p3437_p2 = pnand %p3435_p0, %p3673_p7  ;;  %p3444_p4 = por %p3443_p3, %p3442_p1 }
  0x61   : > { %p3438_p5 = pneg %p3437_p2 }
  0x63   : > { %p3445_p8 = pnand %p3444_p4, %p3438_p5 }
  0x65   : > { %3448 = shalt.err (!%p3445_p8)
}
  0x66   : > { %3042 = dma.hbm_to_vmem [thread:$0]  (!%p3667_p6), %s4036_s8, 2048, %s368_s17, [#allocation15], %s3564_s18, %s3564_s18, %s3565_s27  }
  0x67   : > { %s2495_s23 = sadd.s32 4294967294, %s3557_s16   ;;  %s3740_s26 = sadd.s32 1, %s3557_s16  }
  0x68   : > { %s37_s29 = sadd.s32 1, %s3553_s15  ;;  %s34_s30 = ssub.s32 %s3557_s16, %s3740_s26 }
  0x69   : > { %p44_p7 = scmp.ne.s32.totalorder %s3553_s15, %s3549_s14  ;;  %p35_p9 = scmp.eq.s32.totalorder %s34_s30, 0 }
  0x6a   : > { %p45_p11 = scmp.eq.s32.totalorder %s3557_s16, 0  ;;  %p50_p10 = scmp.ne.s32.totalorder %s3549_s14, %s3545_s13 }
  0x6b   : > { %p263_p12 = scmp.eq.s32.totalorder %s3653_s19, 1  ;;  %p4056_p0 = scmp.eq.s32.totalorder %s3653_s19, 0 }
  0x6c   : > { %s3752_s11 = scalar_select %p35_p9, %s3553_s15, %s37_s29  }
  0x6d   : > { %p46_p13 = por %p45_p11, %p44_p7  ;;  %p3756_p2 = por %p4056_p0, %p50_p10 }
  0x6e   : > { %p3760_p6 = por %p263_p12, %p44_p7  ;;  %p269_p5 = scmp.eq.s32.totalorder %s2495_s23, 1 }
  0x6f   : > { %s4057_s21 = scalar_select %p3756_p2, 1, 0 }
  0x70   : > { %s4058_s18 = scalar_select %p3760_p6, 1, 0 }
  0x71   : > { %p3058_p1 = scmp.lt.s32.totalorder %s3557_s16, 2  ;;  %s384_s27 = sand.u32 1, %s3553_s15  }
  0x72   : > { %p3766_p3 = por %p269_p5, %p50_p10  ;;  %s2505_s12 = sshll.u32 %s384_s27, 3 }
  0x73   : > { %s2506_s24 = sshll.u32 %s3557_s16, 7  ;;  %s388_s29 = scalar_lea.vmem [#allocation2], %s2505_s12 }
  0x74   : > { %s4059_s17 = scalar_select %p3766_p3, 1, 0 }
  0x75   : > { %s3774_s28 = scalar_lea.hbm %s4028_s0, %s2506_s24  ;;  %s395_s30 = sshll.u32 %s388_s29, 4  ;;  %s396_s30 = int_to_ptr.vmem [resolvable:$true] %s395_s30 }
  0x76   : > { %p3776_p4 = pnand %p3058_p1, %p46_p13  ;;  %s385_s1 = scalar_lea.sflag [#allocation3], %s384_s27 }
  0x77   : > { %s3449_s2 = scalar_lea.hbm %s3774_s28, 128  ;;  %s3454_s22 = scalar_lea.hbm %s4028_s0, 256 }
  0x78   : > { %p3450_p8 = scmp.ne.s32.totalorder %s3774_s28, %s3449_s2  ;;  %p3451_p7 = pneg %p3776_p4 }
  0x79   : > { %p3455_p10 = scmp.lt.s32.totalorder %s3774_s28, %s4028_s0  ;;  %p3456_p12 = scmp.lt.s32.totalorder %s3454_s22, %s3449_s2 }
  0x7a   : > { %p3452_p9 = pnand %p3451_p7, %p3450_p8 }
  0x7b   : > { %p3457_p13 = por %p3456_p12, %p3455_p10 }
  0x7c   : > { %p3453_p11 = pneg %p3452_p9 }
  0x7e   : > { %p3458_p0 = pnand %p3457_p13, %p3453_p11 }
  0x80   : > { %3461 = shalt.err (!%p3458_p0)
}
  0x81   : > { %s3462_s29 = scalar_lea.vmem %s396_s30, 128  ;;  %s3570_s27 = smov [#allocation2]  }
  0x82   : > { %p3463_p5 = scmp.ne.s32.totalorder %s396_s30, %s3462_s29  ;;  %s3467_s4 = sshll.u32 %s3570_s27, 4  ;;  %s3468_s4 = int_to_ptr.vmem [resolvable:$false] %s3467_s4 }
  0x83   : > { %s3469_s5 = scalar_lea.vmem %s3468_s4, 256  ;;  %p3470_p8 = scmp.lt.s32.totalorder %s396_s30, %s3468_s4 }
  0x84   : > { %p3465_p1 = pnand %p3463_p5, %p3451_p7  ;;  %p3471_p9 = scmp.lt.s32.totalorder %s3469_s5, %s3462_s29 }
  0x86   : > { %p3466_p3 = pneg %p3465_p1  ;;  %p3472_p6 = por %p3471_p9, %p3470_p8 }
  0x88   : > { %p3473_p2 = pnand %p3472_p6, %p3466_p3 }
  0x8a   : > { %3476 = shalt.err (!%p3473_p2)
}
  0x8b   : > { %3046 = dma.hbm_to_vmem [thread:$0]  (!%p3776_p4), %s3774_s28, 128, %s396_s30, %s385_s1  }
  0x8c   : > { %p4061_p11 = scmp.ne.s32.totalorder %s4048_s20, 0 }
  0x8d   : > { %s3797_s2 = sand.u32 (!%p4061_p11), 1, %s3549_s14   ;;  %p4062_p7 = scmp.ne.s32.totalorder (!%p4061_p11), %s4057_s21, 0 }
  0x8e   : > { %404 = sbr.rel (%p4061_p11) target bundleno = 2037 (0x7f5), region = 60  ;;  %s2508_s3 = sshll.u32 (!%p4061_p11), %s3797_s2, 3 }
  0x8f   : > { %s407_s24 = scalar_lea.sflag (!%p4061_p11), [#allocation3], %s3797_s2  ;;  %s3801_s4 = scalar_lea.vmem (!%p4061_p11), [#allocation2], %s2508_s3 }
  0x93   : > { %3520 = dma.done.wait (%p4062_p7), %s407_s24, 128  }
  0x94   : > { %3522 = vsyncadd (%p4062_p7), %s407_s24, 4294967168  ;;  %p4063_p2 = scmp.eq.s32.totalorder %s3653_s19, 0 }
  0x96   : > { %3524 = dma.done.wait (%p4063_p2), [#allocation6], 2112   ;;  %p4064_p6 = pmov %p4063_p2 }
  0x97   : > { %p4065_p3 = pmov %p4063_p2 }
  0x98   : > { %3526 = vsyncadd (%p4064_p6), [#allocation6], 4294965184 }
  0x99   : > { %3528 = dma.done.wait (%p4065_p3), [#allocation9], 7296   ;;  %p4066_p4 = pmov %p4063_p2 }
  0x9a   : > { %p4067_p10 = pmov %p4063_p2 }
  0x9b   : > { %3530 = vsyncadd (%p4066_p4), [#allocation9], 4294960000 }
  0x9c   : > { %3532 = dma.done.wait (%p4067_p10), [#allocation12], 8192   ;;  %p4068_p12 = pmov %p4063_p2 }
  0x9d   : > { %p4069_p13 = pmov %p4063_p2 }
  0x9e   : > { %3534 = vsyncadd (%p4068_p12), [#allocation12], 4294959104 }
  0x9f   : > { %3536 = dma.done.wait (%p4069_p13), [#allocation15], 2048   ;;  %p4070_p0 = pmov %p4063_p2 }
  0xa0   : > { %v3571_v0 = vmov 0   ;;  %v3115_v1 = vld [vmem:[#allocation5 + $0x74] ss:$8 sps:$4 sm:$0xff]   ;;  %v3117_v2 = vld [vmem:[#allocation5 + $0x70] ss:$8 sps:$4 sm:$0xff]   ;;  %v3139_v10 = vld [vmem:[#allocation10 + $0x78] sm:$0xff]   ;;  %v635_v45 = vlaneseq }
  0xa1   : > { %3538 = vsyncadd (%p4070_p0), [#allocation15], 4294965248  ;;  %624 = vmatprep.mubr.bf16.mxu0 %v3571_v0  ;;  %592 = vmatprep.subr.bf16.mxu0 %v3115_v1  ;;  %v3118_v3 = vld [vmem:[#allocation5 + $0x64] ss:$8 sps:$4 sm:$0xff]   ;;  %v3120_v4 = vld [vmem:[#allocation5 + $0x60] ss:$8 sps:$4 sm:$0xff]  }
  0xa2   : > { %593 = vmatpush1.bf16.msra.mxu0 %v3117_v2  ;;  %v3121_v5 = vld [vmem:[#allocation5 + $0x54] ss:$8 sps:$4 sm:$0xff]   ;;  %v3123_v6 = vld [vmem:[#allocation5 + $0x50] ss:$8 sps:$4 sm:$0xff]   ;;  %v3124_v7 = vld [vmem:[#allocation5 + $0x44] ss:$8 sps:$4 sm:$0xff]   ;;  %2669 = vmatprep.subr.bf16.mxu1 %v3139_v10 }
  0xa3   : > { %594 = vmatprep.subr.bf16.mxu0 %v3118_v3  ;;  %v3126_v8 = vld [vmem:[#allocation5 + $0x40] ss:$8 sps:$4 sm:$0xff]   ;;  %v3127_v9 = vld [vmem:[#allocation5 + $0x34] ss:$8 sps:$4 sm:$0xff]   ;;  %v3129_v12 = vld [vmem:[#allocation5 + $0x30] ss:$8 sps:$4 sm:$0xff]  }
  0xa4   : > { %v3140_v11 = vld [vmem:[#allocation10 + $0x38] sm:$0xff]   ;;  %v3142_v13 = vld [vmem:[#allocation10 + $0x70] sm:$0xff]   ;;  %v3145_v17 = vld [vmem:[#allocation10 + $0x68] sm:$0xff]   ;;  %v3572_v29 = vmov 0.0   ;;  %vm3573_vm0 = vmmov 0   ;;  %v636_v46 = vshrl.u32 %v635_v45, 7 }
  0xa5   : > { %2670 = vmatpush3.bf16.msra.mxu1 %v3140_v11  ;;  %v3143_v14 = vld [vmem:[#allocation10 + $0x30] sm:$0xff]   ;;  %v3130_v15 = vld [vmem:[#allocation5 + $0x24] ss:$8 sps:$4 sm:$0xff]   ;;  %v3146_v19 = vld [vmem:[#allocation10 + $0x28] sm:$0xff]   ;;  %vm679_vm1 = vcmask 1040384   ;;  %vm684_vm2 = vcmask 1046528  }
  0xa6   : > { %595 = vmatpush1.bf16.msra.mxu0 %v3120_v4  ;;  %2671 = vmatprep.subr.bf16.mxu1 %v3142_v13  ;;  %v3132_v16 = vld [vmem:[#allocation5 + $0x20] ss:$8 sps:$4 sm:$0xff]   ;;  %v3133_v18 = vld [vmem:[#allocation5 + $0x14] ss:$8 sps:$4 sm:$0xff]   ;;  %v3148_v21 = vld [vmem:[#allocation10 + $0x60] sm:$0xff]   ;;  %v3835_v47 = vsub.s32 0, %v636_v46 }
  0xa7   : > { %596 = vmatprep.subr.bf16.mxu0 %v3121_v5  ;;  %v493_v20 = vld [vmem:[%s3801_s4] sm:$0xff]  ;;  %v3136_v23 = vld [vmem:[#allocation5 + $0x4] ss:$8 sps:$4 sm:$0xff]   ;;  %v3138_v26 = vld [vmem:[#allocation5] ss:$8 sps:$4 sm:$0xff]   ;;  %v3837_v49 = vsub.s32 1, %v636_v46 }
  0xa8   : > { %v3135_v22 = vld [vmem:[#allocation5 + $0x10] ss:$8 sps:$4 sm:$0xff]   ;;  %v494_v24 = vmax.f32 %v493_v20, 0.0  ;;  %v3141_v27 = vld [vmem:[#allocation10 + $0xb8] sm:$0xff]   ;;  %v3144_v30 = vld [vmem:[#allocation10 + $0xb0] sm:$0xff]   ;;  %v641_v50 = vsub.s32 2, %v636_v46 }
  0xa9   : > { %2672 = vmatpush3.bf16.msra.mxu1 %v3143_v14  ;;  %v3149_v25 = vld [vmem:[#allocation10 + $0x20] sm:$0xff]   ;;  %v3147_v31 = vld [vmem:[#allocation10 + $0xa8] sm:$0xff]   ;;  %v3151_v33 = vld [vmem:[#allocation10 + $0x58] sm:$0xff]   ;;  %v661_v52 = vsub.s32 3, %v636_v46  ;;  %s3574_s1 = smov 16   ;;  %s3575_s5 = smov 112  }
  0xaa   : > { %597 = vmatpush1.bf16.msra.mxu0 %v3123_v6  ;;  %2673 = vmatprep.subr.bf16.mxu1 %v3145_v17  ;;  %v495_v28 = vpack.c.bf16 %v494_v24, %v494_v24  ;;  %v3150_v32 = vld [vmem:[#allocation10 + $0xa0] sm:$0xff]   ;;  %v3152_v34 = vld [vmem:[#allocation10 + $0x18] sm:$0xff]   ;;  %v3154_v36 = vld [vmem:[#allocation10 + $0x50] sm:$0xff]   ;;  %s2516_s23 = sshll.u32 %s3797_s2, 4  ;;  %vm1505_vm3 = vcmask 916480   ;;  %vm1498_vm4 = vcmask 130048  }
  0xab   : > { %598 = vmatprep.subr.bf16.mxu0 %v3124_v7  ;;  %v3153_v35 = vld [vmem:[#allocation10 + $0x98] sm:$0xff]   ;;  %v3155_v37 = vld [vmem:[#allocation10 + $0x10] sm:$0xff]   ;;  %v3157_v39 = vld [vmem:[#allocation10 + $0x48] sm:$0xff]   ;;  %s3927_s25 = scalar_lea.vmem [#allocation16], %s2516_s23  ;;  %s2668_s3 = sshll.u32 %s3653_s19, 8 }
  0xac   : > { %v3156_v38 = vld [vmem:[#allocation10 + $0x90] sm:$0xff]   ;;  %v3158_v40 = vld [vmem:[#allocation10 + $0x8] sm:$0xff]   ;;  %v3160_v42 = vld [vmem:[#allocation10 + $0x40] sm:$0xff]   ;;  %s2358_s24 = sshll.u32 %s3927_s25, 4  ;;  %s2344_s20 = scalar_lea.sflag [#allocation4], %s3797_s2  ;;  %s2359_s24 = int_to_ptr.vmem [resolvable:$true] %s2358_s24 }
  0xad   : > { %2674 = vmatpush3.bf16.msra.mxu1 %v3146_v19  ;;  %v3159_v41 = vld [vmem:[#allocation10 + $0x88] sm:$0xff]   ;;  %v3161_v43 = vld [vmem:[#allocation10] sm:$0xff]   ;;  %v633_v48 = vld [vmem:[#allocation7] sm:$0xf]  ;;  %s3477_s21 = scalar_lea.vmem %s2359_s24, 256  ;;  %p4071_p1 = scmp.ne.s32.totalorder %s4058_s18, 0 }
  0xae   : > { %599 = vmatpush1.bf16.msra.mxu0 %v3126_v8  ;;  %2675 = vmatprep.subr.bf16.mxu1 %v3148_v21  ;;  %v3162_v44 = vld [vmem:[#allocation10 + $0x80] sm:$0xff]   ;;  %v638_v51 = vrot.slane %v633_v48, %v3835_v47  ;;  %v658_v53 = vrot.slane %v633_v48, %v3837_v49  ;;  %v642_v54 = vrot.slane %v633_v48, %v641_v50  ;;  %v3850_v4 = vld [vmem:[#allocation8] sm:$0xff]  ;;  %p3478_p5 = scmp.ne.s32.totalorder %s2359_s24, %s3477_s21  ;;  %s3576_s19 = smov [#allocation16]  }
  0xaf   : > { %600 = vmatprep.subr.bf16.mxu0 %v3127_v9  ;;  %v662_v56 = vrot.slane %v633_v48, %v661_v52  ;;  %v3855_v8 = vld [vmem:[#allocation8 + $0x8] sm:$0xff]  ;;  %s3481_s28 = sshll.u32 %s3576_s19, 4  ;;  %s3482_s28 = int_to_ptr.vmem [resolvable:$false] %s3481_s28 }
  0xb0   : > { %v648_v55 = vrot.slane %v638_v51, %v3835_v47  ;;  %v668_v57 = vrot.slane %v658_v53, %v3837_v49  ;;  %v652_v58 = vrot.slane %v642_v54, %v3835_v47  ;;  %p3479_p8 = pnand %p3478_p5, %p4071_p1  ;;  %s3483_s30 = scalar_lea.vmem %s3482_s28, 512 }
  0xb1   : > { %2676 = vmatpush3.bf16.msra.mxu1 %v3149_v25  ;;  %v672_v61 = vrot.slane %v662_v56, %v3837_v49  ;;  %v3164_v25 = vld [vmem:[#allocation11 + $0x30] sm:$0xff]   ;;  %p3484_p11 = scmp.lt.s32.totalorder %s2359_s24, %s3482_s28  ;;  %p3485_p7 = scmp.lt.s32.totalorder %s3483_s30, %s3477_s21 }
  0xb2   : > { %601 = vmatpush1.bf16.msra.mxu0 %v3129_v12  ;;  %2677 = vmatprep.subr.bf16.mxu1 %v3151_v33  ;;  %v3171_v33 = vld [vmem:[#allocation10 + $0x138] sm:$0xff]   ;;  %p3480_p9 = pneg %p3479_p8 }
  0xb3   : > { %602 = vmatprep.subr.bf16.mxu0 %v3130_v15  ;;  %p3486_p2 = por %p3485_p7, %p3484_p11 }
  0xb5   : > { %2678 = vmatpush3.bf16.msra.mxu1 %v3152_v34  ;;  %v3172_v34 = vld [vmem:[#allocation10 + $0xf8] sm:$0xff]   ;;  %p3487_p6 = pnand %p3486_p2, %p3480_p9 }
  0xb6   : > { %603 = vmatpush1.bf16.msra.mxu0 %v3132_v16  ;;  %2679 = vmatprep.subr.bf16.mxu1 %v3154_v36  ;;  %v3175_v36 = vld [vmem:[#allocation10 + $0xf0] sm:$0xff]  }
  0xb7   : > { %604 = vmatprep.subr.bf16.mxu0 %v3133_v18 }
  0xb9   : > { %2680 = vmatpush3.bf16.msra.mxu1 %v3155_v37  ;;  %v3177_v37 = vld [vmem:[#allocation10 + $0x128] sm:$0xff]  }
  0xba   : > { %605 = vmatpush1.bf16.msra.mxu0 %v3135_v22  ;;  %2681 = vmatprep.subr.bf16.mxu1 %v3157_v39  ;;  %v3163_v22 = vld [vmem:[#allocation11 + $0x38] sm:$0xff]   ;;  %v3180_v39 = vld [vmem:[#allocation10 + $0x120] sm:$0xff]  }
  0xbb   : > { %606 = vmatprep.subr.bf16.mxu0 %v3136_v23 }
  0xbd   : > { %2682 = vmatpush3.bf16.msra.mxu1 %v3158_v40  ;;  %v3181_v40 = vld [vmem:[#allocation10 + $0xe0] sm:$0xff]  }
  0xbe   : > { %607 = vmatpush1.bf16.msra.mxu0 %v3138_v26  ;;  %2683 = vmatprep.subr.bf16.mxu1 %v3160_v42  ;;  %v3165_v26 = vld [vmem:[#allocation11 + $0x28] sm:$0xff]   ;;  %v3184_v42 = vld [vmem:[#allocation10 + $0xd8] sm:$0xff]  }
  0xbf   : > { %2829 = vmatprep.subr.bf16.mxu0 %v3572_v29 }
  0xc1   : > { %625 = vmatmul.mubr.bf16.vlgmr.msra.gmra.mxu0 %v495_v28  ;;  %2684 = vmatpush3.bf16.msra.mxu1 %v3161_v43  ;;  %v3167_v28 = vld [vmem:[#allocation11 + $0x18] sm:$0xff]  }
  0xc2   : > { %2830 = vmatpush3.bf16.msra.mxu0 %v3141_v27  ;;  %2849 = vmatprep.subr.bf16.mxu1 %v3572_v29  ;;  %v3166_v27 = vld [vmem:[#allocation11 + $0x20] sm:$0xff]  }
  0xc3   : > { %2831 = vmatprep.subr.bf16.mxu0 %v3572_v29  ;;  %2845 = vmatprep.mubr.msk.bf16.mxu0 %vm3573_vm0, %v3572_v29 }
  0xc6   : > { %2832 = vmatpush3.bf16.msra.mxu0 %v3144_v30  ;;  %v3168_v30 = vld [vmem:[#allocation11 + $0x10] sm:$0xff]  }
  0xc7   : > { %2833 = vmatprep.subr.bf16.mxu0 %v3572_v29 }
  0xca   : > { %2834 = vmatpush3.bf16.msra.mxu0 %v3147_v31  ;;  %v3169_v31 = vld [vmem:[#allocation11 + $0x8] sm:$0xff]  }
  0xcb   : > { %2835 = vmatprep.subr.bf16.mxu0 %v3572_v29 }
  0xce   : > { %2836 = vmatpush3.bf16.msra.mxu0 %v3150_v32  ;;  %v3170_v32 = vld [vmem:[#allocation11] sm:$0xff]  }
  0xcf   : > { %2837 = vmatprep.subr.bf16.mxu0 %v3572_v29 }
  0xd2   : > { %2838 = vmatpush3.bf16.msra.mxu0 %v3153_v35  ;;  %v3174_v35 = vld [vmem:[#allocation10 + $0x130] sm:$0xff]  }
  0xd3   : > { %2839 = vmatprep.subr.bf16.mxu0 %v3572_v29 }
  0xd6   : > { %2840 = vmatpush3.bf16.msra.mxu0 %v3156_v38  ;;  %v3178_v38 = vld [vmem:[#allocation10 + $0xe8] sm:$0xff]  }
  0xd7   : > { %2841 = vmatprep.subr.bf16.mxu0 %v3572_v29 }
  0xda   : > { %2842 = vmatpush3.bf16.msra.mxu0 %v3159_v41  ;;  %v3183_v41 = vld [vmem:[#allocation10 + $0x118] sm:$0xff]  }
  0xdb   : > { %2843 = vmatprep.subr.bf16.mxu0 %v3572_v29 }
  0xde   : > { %2844 = vmatpush3.bf16.msra.mxu0 %v3162_v44 }
  0xdf   : > { %2709 = vmatprep.subr.bf16.mxu0 %v3171_v33  ;;  %v3197_v33 = vld [vmem:[#allocation11 + $0x68] sm:$0xff]  }
 0x181   : > { %v626_v59 = vpop.f32.mrf.mxu0 }
 0x182   : > { %v653_v60 = vmul.f32 %v648_v55, %v626_v59  ;;  %v3173_v55 = vld [vmem:[#allocation10 + $0x178] sm:$0xff]   ;;  %v3182_v59 = vld [vmem:[#allocation10 + $0x160] sm:$0xff]  }
 0x183   : > { %v628_v62 = vpop.f32.mrf.mxu0 }
 0x184   : > { %v3845_v63 = vadd.f32 %v668_v57, %v653_v60  ;;  %v654_v0 = vmul.f32 %v652_v58, %v628_v62  ;;  %v3176_v57 = vld [vmem:[#allocation10 + $0x170] sm:$0xff]   ;;  %v3179_v58 = vld [vmem:[#allocation10 + $0x168] sm:$0xff]   ;;  %v3185_v60 = vld [vmem:[#allocation10 + $0x158] sm:$0xff]  }
 0x185   : > { %v630_v1 = vpop.f32.mrf.mxu0  ;;  %v3187_v62 = vld [vmem:[#allocation10 + $0xd0] sm:$0xff]  }
 0x186   : > { %v1484_v2 = vrot.slane %v3845_v63, 7  ;;  %v3848_v3 = vadd.f32 %v672_v61, %v654_v0  ;;  %v1489_v5 = vrot.slane %v3845_v63, 1  ;;  %v3186_v61 = vld [vmem:[#allocation10 + $0x110] sm:$0xff]   ;;  %v3189_v1 = vld [vmem:[#allocation10 + $0x108] sm:$0xff]  }
 0x187   : > { %v631_v6 = vpop.f32.mrf.mxu0  ;;  %v3188_v0 = vld [vmem:[#allocation10 + $0x150] sm:$0xff]  }
 0x188   : > { %1511 = vrot.lane.b32.xlu0 %v3848_v3, %s3574_s1  ;;  %v675_v7 = vmax.f32 %v3848_v3, 0.0  ;;  %v1486_v9 = vsel %vm679_vm1, 0.0, %v1484_v2  ;;  %v1491_v10 = vsel %vm684_vm2, %v1489_v5, 0.0  ;;  %v3190_v2 = vld [vmem:[#allocation10 + $0xc8] sm:$0xff]   ;;  %v3192_v6 = vld [vmem:[#allocation10 + $0x100] sm:$0xff]  }
 0x189   : > { %v1487_v11 = vmul.f32 %v1486_v9, %v3850_v4  ;;  %v1492_v16 = vmul.f32 %v1491_v10, %v3855_v8  ;;  %v3191_v5 = vld [vmem:[#allocation10 + $0x148] sm:$0xff]   ;;  %v3194_v9 = vld [vmem:[#allocation10 + $0x140] sm:$0xff]  }
 0x18a   : > { %v682_v12 = vrot.slane %v675_v7, 1  ;;  %v688_v13 = vpack.c.bf16 %v675_v7, %v675_v7  ;;  %v677_v14 = vrot.slane %v675_v7, 7  ;;  %v3193_v7 = vld [vmem:[#allocation10 + $0xc0] sm:$0xff]  }
 0x18b   : > { %v1488_v15 = vadd.f32 %v1487_v11, %v3845_v63  ;;  %v1067_v10 = vld [vmem:[%s4034_s6] sm:$0x3] }
 0x18c   : > { %1516 = vrot.lane.b32.xlu0 %v3848_v3, %s3575_s5  ;;  %914 = vmatprep.mubr.bf16.mxu1 %v688_v13  ;;  %v680_v17 = vsel %vm679_vm1, 0.0, %v677_v14  ;;  %v685_v18 = vsel %vm684_vm2, %v682_v12, 0.0  ;;  %v1071_v11 = vrot.slane %v1067_v10, %v3835_v47  ;;  %v1076_v12 = vrot.slane %v1067_v10, %v3837_v49  ;;  %v3221_v10 = vld [vmem:[#allocation13 + $0x48] sm:$0xff]  }
 0x18d   : > { %v3865_v19 = vadd.f32 %v1492_v16, %v1488_v15  ;;  %v681_v20 = vmul.f32 %v680_v17, %v3850_v4  ;;  %v686_v21 = vmul.f32 %v685_v18, %v3855_v8 }
 0x18f   : > { %1495 = vrot.lane.b32.xlu1 %v3865_v19, %s3574_s1  ;;  %v687_v23 = vpack.c.bf16 %v681_v20, %v681_v20  ;;  %v689_v24 = vpack.c.bf16 %v686_v21, %v686_v21 }
 0x191   : > { %915 = vmatmul.mubr.bf16.vlgmr.msra.gmra.mxu1 %v687_v23  ;;  %2846 = vmatmul.mubr.bf16.vlgmr.msra.gmra.mxu0 %v689_v24 }
 0x192   : > { %2850 = vmatpush3.bf16.msra.mxu1 %v3163_v22  ;;  %2865 = vmatprep.mubr.msk.bf16.mxu1 %vm3573_vm0, %v3572_v29 }
 0x193   : > { %1502 = vrot.lane.b32.xlu1 %v3865_v19, %s3575_s5  ;;  %2851 = vmatprep.subr.bf16.mxu1 %v3572_v29  ;;  %s3990_s5 = scalar_lea.hbm %s4038_s10, %s2668_s3 }
 0x194   : > { %2710 = vmatpush3.bf16.msra.mxu0 %v3172_v34  ;;  %v3198_v34 = vld [vmem:[#allocation11 + $0x60] sm:$0xff]  }
 0x195   : > { %2711 = vmatprep.subr.bf16.mxu0 %v3174_v35  ;;  %v3199_v35 = vld [vmem:[#allocation11 + $0x58] sm:$0xff]  }
 0x196   : > { %2852 = vmatpush3.bf16.msra.mxu1 %v3164_v25 }
 0x197   : > { %2853 = vmatprep.subr.bf16.mxu1 %v3572_v29 }
 0x198   : > { %2712 = vmatpush3.bf16.msra.mxu0 %v3175_v36  ;;  %v3200_v36 = vld [vmem:[#allocation11 + $0x50] sm:$0xff]  }
 0x199   : > { %2713 = vmatprep.subr.bf16.mxu0 %v3177_v37  ;;  %v3201_v37 = vld [vmem:[#allocation11 + $0x48] sm:$0xff]  }
 0x19a   : > { %2854 = vmatpush3.bf16.msra.mxu1 %v3165_v26 }
 0x19b   : > { %2855 = vmatprep.subr.bf16.mxu1 %v3572_v29 }
 0x19c   : > { %2714 = vmatpush3.bf16.msra.mxu0 %v3178_v38  ;;  %v3202_v38 = vld [vmem:[#allocation11 + $0x40] sm:$0xff]  }
 0x19d   : > { %2715 = vmatprep.subr.bf16.mxu0 %v3180_v39  ;;  %v3203_v39 = vld [vmem:[#allocation13 + $0x78] sm:$0xff]  }
 0x19e   : > { %2856 = vmatpush3.bf16.msra.mxu1 %v3166_v27 }
 0x19f   : > { %2857 = vmatprep.subr.bf16.mxu1 %v3572_v29 }
 0x1a0   : > { %2716 = vmatpush3.bf16.msra.mxu0 %v3181_v40  ;;  %v3204_v40 = vld [vmem:[#allocation13 + $0x38] sm:$0xff]  }
 0x1a1   : > { %2717 = vmatprep.subr.bf16.mxu0 %v3183_v41  ;;  %v3206_v41 = vld [vmem:[#allocation13 + $0x70] sm:$0xff]  }
 0x1a2   : > { %2858 = vmatpush3.bf16.msra.mxu1 %v3167_v28  ;;  %v3195_v28 = vld [vmem:[#allocation11 + $0x78] sm:$0xff]  }
 0x1a3   : > { %2859 = vmatprep.subr.bf16.mxu1 %v3572_v29 }
 0x1a4   : > { %2718 = vmatpush3.bf16.msra.mxu0 %v3184_v42  ;;  %v3207_v42 = vld [vmem:[#allocation13 + $0x30] sm:$0xff]  }
 0x1a5   : > { %2719 = vmatprep.subr.bf16.mxu0 %v3186_v61  ;;  %v3208_v61 = vld [vmem:[#allocation13 + $0xb0] sm:$0xff]  }
 0x1a6   : > { %2860 = vmatpush3.bf16.msra.mxu1 %v3168_v30 }
 0x1a7   : > { %2861 = vmatprep.subr.bf16.mxu1 %v3572_v29 }
 0x1a8   : > { %2720 = vmatpush3.bf16.msra.mxu0 %v3187_v62  ;;  %v3211_v62 = vld [vmem:[#allocation13 + $0xa8] sm:$0xff]  }
 0x1a9   : > { %2721 = vmatprep.subr.bf16.mxu0 %v3189_v1  ;;  %v3215_v1 = vld [vmem:[#allocation13 + $0x58] sm:$0xff]  }
 0x1aa   : > { %2862 = vmatpush3.bf16.msra.mxu1 %v3169_v31 }
 0x1ab   : > { %2863 = vmatprep.subr.bf16.mxu1 %v3572_v29 }
 0x1ac   : > { %2722 = vmatpush3.bf16.msra.mxu0 %v3190_v2  ;;  %v3216_v2 = vld [vmem:[#allocation13 + $0x18] sm:$0xff]  }
 0x1ad   : > { %2723 = vmatprep.subr.bf16.mxu0 %v3192_v6  ;;  %v3218_v6 = vld [vmem:[#allocation13 + $0x50] sm:$0xff]  }
 0x1ae   : > { %2864 = vmatpush3.bf16.msra.mxu1 %v3170_v32  ;;  %v3196_v32 = vld [vmem:[#allocation11 + $0x70] sm:$0xff]  }
 0x1af   : > { %2869 = vmatprep.subr.bf16.mxu1 %v3572_v29 }
 0x1b0   : > { %2724 = vmatpush3.bf16.msra.mxu0 %v3193_v7  ;;  %v3219_v7 = vld [vmem:[#allocation13 + $0x10] sm:$0xff]  }
 0x1b1   : > { %2889 = vmatprep.subr.bf16.mxu0 %v3572_v29 }
 0x251   : > { %v2685_v43 = vpop.f32.mrf.mxu1  ;;  %v956_v44 = vpop.f32.mrf.mxu0 }
 0x253   : > { %v2686_v45 = vpop.f32.mrf.mxu1  ;;  %v2847_v46 = vpop.f32.mrf.mxu0 }
 0x254   : > { %v2687_v48 = vadd.f32 %v2686_v45, %v2685_v43  ;;  %v3209_v43 = vld [vmem:[#allocation13 + $0x68] sm:$0xff]   ;;  %v3212_v45 = vld [vmem:[#allocation13 + $0x60] sm:$0xff]  }
 0x255   : > { %v2688_v50 = vpop.f32.mrf.mxu1  ;;  %v959_v51 = vpop.f32.mrf.mxu0  ;;  %v3213_v46 = vld [vmem:[#allocation13 + $0x20] sm:$0xff]  }
 0x256   : > { %v957_v52 = vadd.f32 %v2687_v48, %v956_v44  ;;  %v3210_v44 = vld [vmem:[#allocation13 + $0x28] sm:$0xff]  }
 0x257   : > { %v2689_v53 = vpop.f32.mrf.mxu1  ;;  %v2848_v54 = vpop.f32.mrf.mxu0 }
 0x258   : > { %v962_v56 = vpack.c.bf16 %v957_v52, %v957_v52 }
 0x25a   : > { %2866 = vmatmul.mubr.bf16.vlgmr.msra.gmra.mxu1 %v962_v56 }
 0x25b   : > { %2870 = vmatpush3.bf16.msra.mxu1 %v3173_v55  ;;  %2885 = vmatprep.mubr.msk.bf16.mxu1 %vm3573_vm0, %v3572_v29 }
 0x25c   : > { %2871 = vmatprep.subr.bf16.mxu1 %v3572_v29 }
 0x25f   : > { %2872 = vmatpush3.bf16.msra.mxu1 %v3176_v57 }
 0x260   : > { %2873 = vmatprep.subr.bf16.mxu1 %v3572_v29 }
 0x263   : > { %2874 = vmatpush3.bf16.msra.mxu1 %v3179_v58 }
 0x264   : > { %2875 = vmatprep.subr.bf16.mxu1 %v3572_v29 }
 0x267   : > { %2876 = vmatpush3.bf16.msra.mxu1 %v3182_v59  ;;  %v3205_v59 = vld [vmem:[#allocation13 + $0xb8] sm:$0xff]  }
 0x268   : > { %2877 = vmatprep.subr.bf16.mxu1 %v3572_v29 }
 0x26b   : > { %2878 = vmatpush3.bf16.msra.mxu1 %v3185_v60 }
 0x26c   : > { %2879 = vmatprep.subr.bf16.mxu1 %v3572_v29 }
 0x26f   : > { %2880 = vmatpush3.bf16.msra.mxu1 %v3188_v0  ;;  %v3214_v0 = vld [vmem:[#allocation13 + $0xa0] sm:$0xff]  }
 0x270   : > { %2881 = vmatprep.subr.bf16.mxu1 %v3572_v29 }
 0x273   : > { %2882 = vmatpush3.bf16.msra.mxu1 %v3191_v5  ;;  %v3217_v5 = vld [vmem:[#allocation13 + $0x98] sm:$0xff]  }
 0x274   : > { %2883 = vmatprep.subr.bf16.mxu1 %v3572_v29 }
 0x277   : > { %2884 = vmatpush3.bf16.msra.mxu1 %v3194_v9  ;;  %v3220_v9 = vld [vmem:[#allocation13 + $0x90] sm:$0xff]  }
 0x278   : > { %2749 = vmatprep.subr.bf16.mxu1 %v3203_v39  ;;  %v3229_v39 = vld [vmem:[#allocation14 + $0x28] sm:$0xff]  }
 0x31a   : > { %v1061_v13 = vpop.f32.mrf.mxu1 }
 0x31b   : > { %v1072_v14 = vmul.f32 %v1071_v11, %v1061_v13  ;;  %v3222_v11 = vld [vmem:[#allocation13 + $0x8] sm:$0xff]   ;;  %v3224_v13 = vld [vmem:[#allocation13 + $0x40] sm:$0xff]  }
 0x31c   : > { %v2867_v15 = vpop.f32.mrf.mxu1 }
 0x31d   : > { %v1077_v16 = vadd.f32 %v1076_v12, %v1072_v14  ;;  %v3223_v12 = vld [vmem:[#allocation13 + $0x88] sm:$0xff]   ;;  %v3225_v14 = vld [vmem:[#allocation13] sm:$0xff]  }
 0x31e   : > { %v1064_v17 = vpop.f32.mrf.mxu1  ;;  %v3226_v15 = vld [vmem:[#allocation13 + $0x80] sm:$0xff]  }
 0x31f   : > { %v1078_v18 = vmax.f32 %v1077_v16, 0.0  ;;  %v2597_v16 = vld [vmem:[%s4034_s6 + $0x2] sm:$0x3] }
 0x320   : > { %v2868_v20 = vpop.f32.mrf.mxu1  ;;  %v1475_v17 = vrot.slane %v2597_v16, %v3835_v47 }
 0x321   : > { %v1080_v21 = vrot.slane %v1078_v18, 7  ;;  %v1084_v22 = vrot.slane %v1078_v18, 1  ;;  %v1089_v23 = vpack.c.bf16 %v1078_v18, %v1078_v18  ;;  %v1480_v18 = vrot.slane %v2597_v16, %v3837_v49  ;;  %v3253_v16 = vld [vmem:[#allocation13 + $0x108] sm:$0xff]  }
 0x323   : > { %1316 = vmatprep.mubr.bf16.mxu0 %v1089_v23  ;;  %v1082_v24 = vsel %vm679_vm1, 0.0, %v1080_v21  ;;  %v1086_v25 = vsel %vm684_vm2, %v1084_v22, 0.0 }
 0x324   : > { %v1083_v26 = vmul.f32 %v1082_v24, %v3850_v4  ;;  %v1087_v27 = vmul.f32 %v1086_v25, %v3855_v8 }
 0x326   : > { %v1088_v30 = vpack.c.bf16 %v1083_v26, %v1083_v26  ;;  %v1090_v31 = vpack.c.bf16 %v1087_v27, %v1087_v27 }
 0x328   : > { %1317 = vmatmul.mubr.bf16.vlgmr.msra.gmra.mxu0 %v1088_v30  ;;  %2886 = vmatmul.mubr.bf16.vlgmr.msra.gmra.mxu1 %v1090_v31 }
 0x329   : > { %2890 = vmatpush3.bf16.msra.mxu0 %v3195_v28  ;;  %2905 = vmatprep.mubr.msk.bf16.mxu0 %vm3573_vm0, %v3572_v29 }
 0x32a   : > { %2891 = vmatprep.subr.bf16.mxu0 %v3572_v29  ;;  %2750 = vmatpush3.bf16.msra.mxu1 %v3204_v40  ;;  %v3230_v40 = vld [vmem:[#allocation14 + $0x20] sm:$0xff]  }
 0x32b   : > { %2751 = vmatprep.subr.bf16.mxu1 %v3206_v41  ;;  %v3231_v41 = vld [vmem:[#allocation14 + $0x18] sm:$0xff]  }
 0x32d   : > { %2892 = vmatpush3.bf16.msra.mxu0 %v3196_v32 }
 0x32e   : > { %2893 = vmatprep.subr.bf16.mxu0 %v3572_v29  ;;  %2752 = vmatpush3.bf16.msra.mxu1 %v3207_v42  ;;  %v3232_v42 = vld [vmem:[#allocation14 + $0x10] sm:$0xff]  }
 0x32f   : > { %2753 = vmatprep.subr.bf16.mxu1 %v3209_v43  ;;  %v3233_v43 = vld [vmem:[#allocation14 + $0x8] sm:$0xff]  }
 0x331   : > { %2894 = vmatpush3.bf16.msra.mxu0 %v3197_v33 }
 0x332   : > { %2895 = vmatprep.subr.bf16.mxu0 %v3572_v29  ;;  %2754 = vmatpush3.bf16.msra.mxu1 %v3210_v44  ;;  %v3234_v44 = vld [vmem:[#allocation14] sm:$0xff]  }
 0x333   : > { %2755 = vmatprep.subr.bf16.mxu1 %v3212_v45  ;;  %v3235_v45 = vld [vmem:[#allocation13 + $0x138] sm:$0xff]  }
 0x335   : > { %2896 = vmatpush3.bf16.msra.mxu0 %v3198_v34 }
 0x336   : > { %2897 = vmatprep.subr.bf16.mxu0 %v3572_v29  ;;  %2756 = vmatpush3.bf16.msra.mxu1 %v3213_v46  ;;  %v3236_v46 = vld [vmem:[#allocation13 + $0xf8] sm:$0xff]  }
 0x337   : > { %2757 = vmatprep.subr.bf16.mxu1 %v3215_v1 }
 0x339   : > { %2898 = vmatpush3.bf16.msra.mxu0 %v3199_v35 }
 0x33a   : > { %2899 = vmatprep.subr.bf16.mxu0 %v3572_v29  ;;  %2758 = vmatpush3.bf16.msra.mxu1 %v3216_v2 }
 0x33b   : > { %2759 = vmatprep.subr.bf16.mxu1 %v3218_v6  ;;  %v3237_v6 = vld [vmem:[#allocation13 + $0x178] sm:$0xff]  }
 0x33d   : > { %2900 = vmatpush3.bf16.msra.mxu0 %v3200_v36  ;;  %v3227_v36 = vld [vmem:[#allocation14 + $0x38] sm:$0xff]  }
 0x33e   : > { %2901 = vmatprep.subr.bf16.mxu0 %v3572_v29  ;;  %2760 = vmatpush3.bf16.msra.mxu1 %v3219_v7 }
 0x33f   : > { %2761 = vmatprep.subr.bf16.mxu1 %v3221_v10  ;;  %v3243_v10 = vld [vmem:[#allocation13 + $0x168] sm:$0xff]  }
 0x341   : > { %2902 = vmatpush3.bf16.msra.mxu0 %v3201_v37 }
 0x342   : > { %2903 = vmatprep.subr.bf16.mxu0 %v3572_v29  ;;  %2762 = vmatpush3.bf16.msra.mxu1 %v3222_v11  ;;  %v3246_v11 = vld [vmem:[#allocation13 + $0x160] sm:$0xff]  }
 0x343   : > { %2763 = vmatprep.subr.bf16.mxu1 %v3224_v13  ;;  %v3250_v13 = vld [vmem:[#allocation13 + $0x110] sm:$0xff]  }
 0x345   : > { %2904 = vmatpush3.bf16.msra.mxu0 %v3202_v38  ;;  %v3228_v38 = vld [vmem:[#allocation14 + $0x30] sm:$0xff]  }
 0x346   : > { %2909 = vmatprep.subr.bf16.mxu0 %v3572_v29  ;;  %2764 = vmatpush3.bf16.msra.mxu1 %v3225_v14  ;;  %v3251_v14 = vld [vmem:[#allocation13 + $0xd0] sm:$0xff]  }
 0x347   : > { %2929 = vmatprep.subr.bf16.mxu1 %v3572_v29 }
 0x3e8   : > { %v2725_v48 = vpop.f32.mrf.mxu0  ;;  %v1358_v50 = vpop.f32.mrf.mxu1 }
 0x3ea   : > { %v2726_v51 = vpop.f32.mrf.mxu0  ;;  %v2887_v52 = vpop.f32.mrf.mxu1 }
 0x3eb   : > { %v2727_v53 = vadd.f32 %v2726_v51, %v2725_v48  ;;  %v3238_v48 = vld [vmem:[#allocation13 + $0x130] sm:$0xff]   ;;  %v3241_v51 = vld [vmem:[#allocation13 + $0x128] sm:$0xff]  }
 0x3ec   : > { %v2728_v54 = vpop.f32.mrf.mxu0  ;;  %v1361_v55 = vpop.f32.mrf.mxu1  ;;  %v3242_v52 = vld [vmem:[#allocation13 + $0xe8] sm:$0xff]  }
 0x3ed   : > { %v1359_v56 = vadd.f32 %v2727_v53, %v1358_v50  ;;  %v3239_v50 = vld [vmem:[#allocation13 + $0xf0] sm:$0xff]   ;;  %v3244_v53 = vld [vmem:[#allocation13 + $0x120] sm:$0xff]   ;;  %v3247_v55 = vld [vmem:[#allocation13 + $0x118] sm:$0xff]  }
 0x3ee   : > { %v2729_v57 = vpop.f32.mrf.mxu0  ;;  %v2888_v58 = vpop.f32.mrf.mxu1  ;;  %v3245_v54 = vld [vmem:[#allocation13 + $0xe0] sm:$0xff]  }
 0x3ef   : > { %v1364_v60 = vpack.c.bf16 %v1359_v56, %v1359_v56  ;;  %v3248_v56 = vld [vmem:[#allocation13 + $0xd8] sm:$0xff]  }
 0x3f1   : > { %2906 = vmatmul.mubr.bf16.vlgmr.msra.gmra.mxu0 %v1364_v60 }
 0x3f2   : > { %2910 = vmatpush3.bf16.msra.mxu0 %v3205_v59  ;;  %2925 = vmatprep.mubr.msk.bf16.mxu0 %vm3573_vm0, %v3572_v29 }
 0x3f3   : > { %2911 = vmatprep.subr.bf16.mxu0 %v3572_v29 }
 0x3f6   : > { %2912 = vmatpush3.bf16.msra.mxu0 %v3208_v61 }
 0x3f7   : > { %2913 = vmatprep.subr.bf16.mxu0 %v3572_v29 }
 0x3fa   : > { %2914 = vmatpush3.bf16.msra.mxu0 %v3211_v62 }
 0x3fb   : > { %2915 = vmatprep.subr.bf16.mxu0 %v3572_v29 }
 0x3fe   : > { %2916 = vmatpush3.bf16.msra.mxu0 %v3214_v0 }
 0x3ff   : > { %2917 = vmatprep.subr.bf16.mxu0 %v3572_v29 }
 0x402   : > { %2918 = vmatpush3.bf16.msra.mxu0 %v3217_v5 }
 0x403   : > { %2919 = vmatprep.subr.bf16.mxu0 %v3572_v29 }
 0x406   : > { %2920 = vmatpush3.bf16.msra.mxu0 %v3220_v9  ;;  %v3240_v9 = vld [vmem:[#allocation13 + $0x170] sm:$0xff]  }
 0x407   : > { %2921 = vmatprep.subr.bf16.mxu0 %v3572_v29 }
 0x40a   : > { %2922 = vmatpush3.bf16.msra.mxu0 %v3223_v12  ;;  %v3249_v12 = vld [vmem:[#allocation13 + $0x158] sm:$0xff]  }
 0x40b   : > { %2923 = vmatprep.subr.bf16.mxu0 %v3572_v29 }
 0x40e   : > { %2924 = vmatpush3.bf16.msra.mxu0 %v3226_v15  ;;  %v3252_v15 = vld [vmem:[#allocation13 + $0x150] sm:$0xff]  }
 0x40f   : > { %2789 = vmatprep.subr.bf16.mxu0 %v3235_v45  ;;  %v3264_v45 = vld [vmem:[#allocation14 + $0x50] sm:$0xff]  }
 0x4b1   : > { %v1464_v20 = vpop.f32.mrf.mxu0 }
 0x4b2   : > { %v1476_v21 = vmul.f32 %v1475_v17, %v1464_v20  ;;  %v3254_v17 = vld [vmem:[#allocation13 + $0xc8] sm:$0xff]   ;;  %v3256_v20 = vld [vmem:[#allocation13 + $0x100] sm:$0xff]  }
 0x4b3   : > { %v2907_v22 = vpop.f32.mrf.mxu0 }
 0x4b4   : > { %v1481_v23 = vadd.f32 %v1480_v18, %v1476_v21  ;;  %v3255_v18 = vld [vmem:[#allocation13 + $0x148] sm:$0xff]   ;;  %v3257_v21 = vld [vmem:[#allocation13 + $0xc0] sm:$0xff]  }
 0x4b5   : > { %v1467_v24 = vpop.f32.mrf.mxu0  ;;  %v3258_v22 = vld [vmem:[#allocation13 + $0x140] sm:$0xff]  }
 0x4b6   : > { %v1482_v25 = vadd.f32 %v1481_v23, %v3845_v63  ;;  %v1925_v23 = vld [vmem:[%s4037_s9] sm:$0x3] }
 0x4b7   : > { %v2908_v26 = vpop.f32.mrf.mxu0  ;;  %v1929_v24 = vrot.slane %v1925_v23, %v3835_v47 }
 0x4b8   : > { %v1535_v27 = vmax.f32 %v1482_v25, 0.0  ;;  %2341 = vst [vmem:[%s3927_s25] sm:$0xff] %v1482_v25  ;;  %v1934_v25 = vrot.slane %v1925_v23, %v3837_v49 }
 0x4ba   : > { %v1546_v28 = vpack.c.bf16 %v1535_v27, %v1535_v27  ;;  %v1537_v30 = vrot.slane %v1535_v27, 7  ;;  %v1541_v31 = vrot.slane %v1535_v27, 1 }
 0x4bc   : > { %1772 = vmatprep.mubr.bf16.mxu1 %v1546_v28  ;;  %v1539_v32 = vsel %vm679_vm1, 0.0, %v1537_v30  ;;  %v1543_v33 = vsel %vm684_vm2, %v1541_v31, 0.0 }
 0x4bd   : > { %v1540_v34 = vmul.f32 %v1539_v32, %v3850_v4  ;;  %v1544_v35 = vmul.f32 %v1543_v33, %v3855_v8 }
 0x4bf   : > { %v1545_v63 = vpack.c.bf16 %v1540_v34, %v1540_v34  ;;  %v1547_v37 = vpack.c.bf16 %v1544_v35, %v1544_v35 }
 0x4c1   : > { %1773 = vmatmul.mubr.bf16.vlgmr.msra.gmra.mxu1 %v1545_v63  ;;  %2926 = vmatmul.mubr.bf16.vlgmr.msra.gmra.mxu0 %v1547_v37 }
 0x4c2   : > { %2930 = vmatpush3.bf16.msra.mxu1 %v3227_v36  ;;  %2945 = vmatprep.mubr.msk.bf16.mxu1 %vm3573_vm0, %v3572_v29 }
 0x4c3   : > { %2931 = vmatprep.subr.bf16.mxu1 %v3572_v29  ;;  %2790 = vmatpush3.bf16.msra.mxu0 %v3236_v46  ;;  %v3265_v46 = vld [vmem:[#allocation14 + $0x48] sm:$0xff]  }
 0x4c4   : > { %2791 = vmatprep.subr.bf16.mxu0 %v3238_v48  ;;  %v3266_v48 = vld [vmem:[#allocation14 + $0x40] sm:$0xff]  }
 0x4c6   : > { %2932 = vmatpush3.bf16.msra.mxu1 %v3228_v38 }
 0x4c7   : > { %2933 = vmatprep.subr.bf16.mxu1 %v3572_v29  ;;  %2792 = vmatpush3.bf16.msra.mxu0 %v3239_v50 }
 0x4c8   : > { %2793 = vmatprep.subr.bf16.mxu0 %v3241_v51 }
 0x4ca   : > { %2934 = vmatpush3.bf16.msra.mxu1 %v3229_v39 }
 0x4cb   : > { %2935 = vmatprep.subr.bf16.mxu1 %v3572_v29  ;;  %2794 = vmatpush3.bf16.msra.mxu0 %v3242_v52 }
 0x4cc   : > { %2795 = vmatprep.subr.bf16.mxu0 %v3244_v53 }
 0x4ce   : > { %2936 = vmatpush3.bf16.msra.mxu1 %v3230_v40  ;;  %v3259_v40 = vld [vmem:[#allocation14 + $0x78] sm:$0xff]  }
 0x4cf   : > { %2937 = vmatprep.subr.bf16.mxu1 %v3572_v29  ;;  %2796 = vmatpush3.bf16.msra.mxu0 %v3245_v54 }
 0x4d0   : > { %2797 = vmatprep.subr.bf16.mxu0 %v3247_v55 }
 0x4d2   : > { %2938 = vmatpush3.bf16.msra.mxu1 %v3231_v41 }
 0x4d3   : > { %2939 = vmatprep.subr.bf16.mxu1 %v3572_v29  ;;  %2798 = vmatpush3.bf16.msra.mxu0 %v3248_v56 }
 0x4d4   : > { %2799 = vmatprep.subr.bf16.mxu0 %v3250_v13 }
 0x4d6   : > { %2940 = vmatpush3.bf16.msra.mxu1 %v3232_v42 }
 0x4d7   : > { %2941 = vmatprep.subr.bf16.mxu1 %v3572_v29  ;;  %2800 = vmatpush3.bf16.msra.mxu0 %v3251_v14 }
 0x4d8   : > { %2801 = vmatprep.subr.bf16.mxu0 %v3253_v16  ;;  %v480_v16 = vld [vmem:[#allocation8 + $0x10] sm:$0xff] }
 0x4da   : > { %2942 = vmatpush3.bf16.msra.mxu1 %v3233_v43  ;;  %v3260_v43 = vld [vmem:[#allocation14 + $0x70] sm:$0xff]  }
 0x4db   : > { %2943 = vmatprep.subr.bf16.mxu1 %v3572_v29  ;;  %2802 = vmatpush3.bf16.msra.mxu0 %v3254_v17 }
 0x4dc   : > { %2803 = vmatprep.subr.bf16.mxu0 %v3256_v20  ;;  %v488_v20 = vld [vmem:[#allocation8 + $0x30] sm:$0xff] }
 0x4de   : > { %2944 = vmatpush3.bf16.msra.mxu1 %v3234_v44  ;;  %v3261_v44 = vld [vmem:[#allocation14 + $0x68] sm:$0xff]  }
 0x4df   : > { %2949 = vmatprep.subr.bf16.mxu1 %v3572_v29  ;;  %2804 = vmatpush3.bf16.msra.mxu0 %v3257_v21  ;;  %v482_v21 = vld [vmem:[#allocation8 + $0x18] sm:$0xff] }
 0x4e0   : > { %2969 = vmatprep.subr.bf16.mxu0 %v3572_v29 }
 0x581   : > { %v2765_v57 = vpop.f32.mrf.mxu1  ;;  %v1814_v58 = vpop.f32.mrf.mxu0 }
 0x583   : > { %v2766_v59 = vpop.f32.mrf.mxu1  ;;  %v2927_v60 = vpop.f32.mrf.mxu0 }
 0x584   : > { %v2767_v61 = vadd.f32 %v2766_v59, %v2765_v57 }
 0x585   : > { %v2768_v62 = vpop.f32.mrf.mxu1  ;;  %v1817_v0 = vpop.f32.mrf.mxu0 }
 0x586   : > { %v1815_v1 = vadd.f32 %v2767_v61, %v1814_v58  ;;  %v1512_v61 = vpop.permute.xlu0 %1511  ;;  %v492_v0 = vld [vmem:[#allocation8 + $0x40] sm:$0xff] }
 0x587   : > { %v2769_v2 = vpop.f32.mrf.mxu1  ;;  %v2928_v5 = vpop.f32.mrf.mxu0 }
 0x588   : > { %v1820_v7 = vpack.c.bf16 %v1815_v1, %v1815_v1  ;;  %v490_v1 = vld [vmem:[#allocation8 + $0x38] sm:$0xff]  ;;  %v1514_v2 = vsel %vm1498_vm4, 0.0, %v1512_v61 }
 0x58a   : > { %2946 = vmatmul.mubr.bf16.vlgmr.msra.gmra.mxu1 %v1820_v7  ;;  %v1517_v62 = vpop.permute.xlu0 %1516 }
 0x58b   : > { %2950 = vmatpush3.bf16.msra.mxu1 %v3237_v6  ;;  %2965 = vmatprep.mubr.msk.bf16.mxu1 %vm3573_vm0, %v3572_v29  ;;  %v1515_v6 = vadd.f32 %v1514_v2, %v490_v1 }
 0x58c   : > { %2951 = vmatprep.subr.bf16.mxu1 %v3572_v29 }
 0x58f   : > { %2952 = vmatpush3.bf16.msra.mxu1 %v3240_v9 }
 0x590   : > { %2953 = vmatprep.subr.bf16.mxu1 %v3572_v29 }
 0x593   : > { %2954 = vmatpush3.bf16.msra.mxu1 %v3243_v10  ;;  %v1496_v10 = vpop.permute.xlu1 %1495 }
 0x594   : > { %2955 = vmatprep.subr.bf16.mxu1 %v3572_v29  ;;  %v1499_v17 = vsel %vm1498_vm4, 0.0, %v1496_v10 }
 0x595   : > { %v1500_v23 = vmul.f32 %v1499_v17, %v480_v16 }
 0x597   : > { %2956 = vmatpush3.bf16.msra.mxu1 %v3246_v11  ;;  %v1503_v13 = vpop.permute.xlu1 %1502 }
 0x598   : > { %2957 = vmatprep.subr.bf16.mxu1 %v3572_v29 }
 0x59b   : > { %2958 = vmatpush3.bf16.msra.mxu1 %v3249_v12 }
 0x59c   : > { %2959 = vmatprep.subr.bf16.mxu1 %v3572_v29 }
 0x59f   : > { %2960 = vmatpush3.bf16.msra.mxu1 %v3252_v15 }
 0x5a0   : > { %2961 = vmatprep.subr.bf16.mxu1 %v3572_v29 }
 0x5a3   : > { %2962 = vmatpush3.bf16.msra.mxu1 %v3255_v18  ;;  %v486_v18 = vld [vmem:[#allocation8 + $0x28] sm:$0xff] }
 0x5a4   : > { %2963 = vmatprep.subr.bf16.mxu1 %v3572_v29 }
 0x5a7   : > { %2964 = vmatpush3.bf16.msra.mxu1 %v3258_v22  ;;  %v1506_v22 = vsel %vm1505_vm3, %v1503_v13, 0.0 }
 0x64a   : > { %v1919_v26 = vpop.f32.mrf.mxu1 }
 0x64b   : > { %v1930_v27 = vmul.f32 %v1929_v24, %v1919_v26  ;;  %v2662_v26 = vld [vmem:[%s4037_s9 + $0x2] sm:$0x3] }
 0x64c   : > { %v2947_v28 = vpop.f32.mrf.mxu1 }
 0x64d   : > { %v1935_v30 = vadd.f32 %v1934_v25, %v1930_v27  ;;  %v1507_v25 = vmul.f32 %v1506_v22, %v482_v21  ;;  %v1501_v27 = vadd.f32 %v1500_v23, %v3865_v19 }
 0x64e   : > { %v1922_v31 = vpop.f32.mrf.mxu1 }
 0x64f   : > { %v1936_v32 = vmax.f32 %v1935_v30, 0.0  ;;  %v1508_v30 = vadd.f32 %v1507_v25, %v1501_v27  ;;  %v2333_v31 = vrot.slane %v2662_v26, %v3835_v47 }
 0x650   : > { %v2948_v33 = vpop.f32.mrf.mxu1 }
 0x651   : > { %v1938_v34 = vrot.slane %v1936_v32, 7  ;;  %v1942_v35 = vrot.slane %v1936_v32, 1  ;;  %v1947_v36 = vpack.c.bf16 %v1936_v32, %v1936_v32  ;;  %v484_v32 = vld [vmem:[#allocation8 + $0x20] sm:$0xff] }
 0x653   : > { %2174 = vmatprep.mubr.bf16.mxu0 %v1947_v36  ;;  %v1940_v63 = vsel %vm679_vm1, 0.0, %v1938_v34  ;;  %v1944_v37 = vsel %vm684_vm2, %v1942_v35, 0.0  ;;  %v2338_v34 = vrot.slane %v2662_v26, %v3837_v49  ;;  %v1509_v36 = vmul.f32 %v1508_v30, %v484_v32 }
 0x654   : > { %v1941_v38 = vmul.f32 %v1940_v63, %v3850_v4  ;;  %v1945_v39 = vmul.f32 %v1944_v37, %v3855_v8  ;;  %v3262_v4 = vld [vmem:[#allocation14 + $0x60] sm:$0xff]   ;;  %v3263_v8 = vld [vmem:[#allocation14 + $0x58] sm:$0xff]  }
 0x656   : > { %v1946_v41 = vpack.c.bf16 %v1941_v38, %v1941_v38  ;;  %v1948_v42 = vpack.c.bf16 %v1945_v39, %v1945_v39 }
 0x658   : > { %2175 = vmatmul.mubr.bf16.vlgmr.msra.gmra.mxu0 %v1946_v41  ;;  %2966 = vmatmul.mubr.bf16.vlgmr.msra.gmra.mxu1 %v1948_v42 }
 0x659   : > { %2970 = vmatpush3.bf16.msra.mxu0 %v3259_v40  ;;  %2985 = vmatprep.mubr.msk.bf16.mxu0 %vm3573_vm0, %v3572_v29 }
 0x65a   : > { %2971 = vmatprep.subr.bf16.mxu0 %v3572_v29 }
 0x65d   : > { %2972 = vmatpush3.bf16.msra.mxu0 %v3260_v43 }
 0x65e   : > { %2973 = vmatprep.subr.bf16.mxu0 %v3572_v29 }
 0x661   : > { %2974 = vmatpush3.bf16.msra.mxu0 %v3261_v44 }
 0x662   : > { %2975 = vmatprep.subr.bf16.mxu0 %v3572_v29 }
 0x665   : > { %2976 = vmatpush3.bf16.msra.mxu0 %v3262_v4 }
 0x666   : > { %2977 = vmatprep.subr.bf16.mxu0 %v3572_v29 }
 0x669   : > { %2978 = vmatpush3.bf16.msra.mxu0 %v3263_v8 }
 0x66a   : > { %2979 = vmatprep.subr.bf16.mxu0 %v3572_v29 }
 0x66d   : > { %2980 = vmatpush3.bf16.msra.mxu0 %v3264_v45 }
 0x66e   : > { %2981 = vmatprep.subr.bf16.mxu0 %v3572_v29 }
 0x671   : > { %2982 = vmatpush3.bf16.msra.mxu0 %v3265_v46 }
 0x672   : > { %2983 = vmatprep.subr.bf16.mxu0 %v3572_v29  ;;  %v1519_v29 = vsel %vm1505_vm3, %v1517_v62, 0.0 }
 0x673   : > { %v1520_v5 = vadd.f32 %v1519_v29, %v492_v0 }
 0x675   : > { %2984 = vmatpush3.bf16.msra.mxu0 %v3266_v48  ;;  %v1521_v7 = vmax.f32 %v1515_v6, %v1520_v5 }
 0x677   : > { %v1522_v9 = vmax.f32 %v3848_v3, %v1521_v7 }
 0x679   : > { %v1524_v11 = vrot.slane %v1522_v9, 7  ;;  %v1528_v12 = vrot.slane %v1522_v9, 1 }
 0x67b   : > { %v1526_v14 = vsel %vm679_vm1, 0.0, %v1524_v11  ;;  %v1530_v15 = vsel %vm684_vm2, %v1528_v12, 0.0 }
 0x67c   : > { %v1527_v24 = vadd.f32 %v1526_v14, %v486_v18  ;;  %v1531_v3 = vadd.f32 %v1530_v15, %v488_v20 }
 0x67e   : > { %v1532_v28 = vmax.f32 %v1527_v24, %v1531_v3 }
 0x680   : > { %v1533_v33 = vmax.f32 %v1522_v9, %v1532_v28 }
 0x682   : > { %v1534_v38 = vadd.f32 %v1533_v33, %v1509_v36 }
 0x718   : > { %v2805_v50 = vpop.f32.mrf.mxu0  ;;  %v2216_v51 = vpop.f32.mrf.mxu1 }
 0x71a   : > { %v2806_v52 = vpop.f32.mrf.mxu0  ;;  %v2967_v53 = vpop.f32.mrf.mxu1 }
 0x71b   : > { %v2807_v54 = vadd.f32 %v2806_v52, %v2805_v50 }
 0x71c   : > { %v2808_v55 = vpop.f32.mrf.mxu0  ;;  %v2219_v56 = vpop.f32.mrf.mxu1 }
 0x71d   : > { %v2217_v57 = vadd.f32 %v2807_v54, %v2216_v51 }
 0x71e   : > { %v2809_v58 = vpop.f32.mrf.mxu0  ;;  %v2968_v59 = vpop.f32.mrf.mxu1 }
 0x71f   : > { %v2222_v60 = vpack.c.bf16 %v2217_v57, %v2217_v57 }
 0x721   : > { %2986 = vmatmul.mubr.bf16.vlgmr.msra.gmra.mxu0 %v2222_v60 }
 0x7e1   : > { %v2322_v35 = vpop.f32.mrf.mxu0 }
 0x7e2   : > { %v2334_v63 = vmul.f32 %v2333_v31, %v2322_v35 }
 0x7e3   : > { %v2987_v37 = vpop.f32.mrf.mxu0 }
 0x7e4   : > { %v2339_v39 = vadd.f32 %v2338_v34, %v2334_v63 }
 0x7e5   : > { %v2325_v19 = vpop.f32.mrf.mxu0 }
 0x7e6   : > { %v2340_v40 = vadd.f32 %v2339_v39, %v1534_v38 }
 0x7e7   : > { %v2988_v47 = vpop.f32.mrf.mxu0 }
 0x7e8   : > { %2342 = vst [vmem:[%s3927_s25 + $0x8] sm:$0xff] %v2340_v40 }
 0x7e9   : > { %3490 = shalt.err (!%p3487_p6)
}
 0x7ea   : > { %s3491_s23 = scalar_lea.hbm %s3990_s5, 256  ;;  %s3495_s22 = scalar_lea.hbm %s4038_s10, 512 }
 0x7eb   : > { %p3492_p3 = scmp.ne.s32.totalorder %s3990_s5, %s3491_s23  ;;  %p3496_p12 = scmp.lt.s32.totalorder %s3990_s5, %s4038_s10 }
 0x7ec   : > { %p3497_p13 = scmp.lt.s32.totalorder %s3495_s22, %s3491_s23 }
 0x7ed   : > { %p3493_p4 = pnand %p3492_p3, %p4071_p1 }
 0x7ee   : > { %p3498_p0 = por %p3497_p13, %p3496_p12 }
 0x7ef   : > { %p3494_p10 = pneg %p3493_p4 }
 0x7f1   : > { %p3499_p5 = pnand %p3498_p0, %p3494_p10 }
 0x7f3   : > { %3502 = shalt.err (!%p3499_p5)
}
 0x7f4   : > { %3019 = dma.vmem_to_hbm [thread:$0]  (%p4071_p1), %s2359_s24, 256, %s3990_s5, %s2344_s20  }
 0x7f5 PF: > { %s2370_s27 = sand.u32 1, %s3545_s13   ;;  %p4072_p8 = scmp.ne.s32.totalorder %s4059_s17, 0 }
 0x7f6   : > { %p4073_p9 = scmp.ge.s32.totalorder %s3557_s16, 2  ;;  %s2371_s3 = scalar_lea.sflag [#allocation4], %s2370_s27 }
 0x7f8   : > { %p3048_p11 = pnand %p4073_p9, %p4072_p8 }
 0x7fa   : > { %p3049_p7 = pneg %p3048_p11 }
 0x7fc   : > { %3540 = dma.done.wait (%p3049_p7), %s2371_s3, 256  }
 0x7fd   : > { %3542 = vsyncadd (%p3049_p7), %s2371_s3, 4294967040  ;;  %p27_p2 = scmp.ge.s32.totalorder %s3740_s26, 4   ;;  %s4074_s13 = smov %s3549_s14 }
 0x7fe   : > { %s4075_s14 = smov %s3553_s15  ;;  %s4076_s15 = smov %s3752_s11 }
 0x7ff   : > { %s4077_s16 = smov %s3740_s26  ;;  %29 = sbr.rel (!%p27_p2) target bundleno = 15 (0xf), region = 147 }
 0x804   :  { %2376 = vsyncpa [#allocation3], 1 }
 0x805   :  { %2378 = vsyncpa [#allocation3 + $0x1], 1 }
 0x806   :  { %2379 = vsyncpa [#allocation6], 1 }
 0x807   :  { %2380 = vsyncpa [#allocation9], 1 }
 0x808   :  { %2381 = vsyncpa [#allocation12], 1 }
 0x809   :  { %2382 = vsyncpa [#allocation15], 1 }
 0x80a   :  { %2383 = vsyncpa [#allocation4], 1 }
 0x80b   :  { %2385 = vsyncpa [#allocation4 + $0x1], 1 }

</bundles_post_ra>
